<compile_context>
chip_gen: v5e
topology: v5e:2x2
jax: 0.10.0
libtpu: 0.0.40
codegen_flags: <defaults>
</compile_context>

<pallas_src>
import jax
import jax.numpy as jnp
from jax.experimental import pallas as pl
from jax.experimental.pallas import tpu as pltpu

LANE = 128
FUSED_VMEM_BUDGET = 24 * 1024 * 1024  # above this, switch to the two-pass tiled path


def _round_up(x, m):
    return ((x + m - 1) // m) * m


def _pad2d(arr, rows=None, cols=None):
    r, c = arr.shape
    pr = 0 if rows is None else rows - r
    pc = 0 if cols is None else cols - c
    return jnp.pad(arr, ((0, pr), (0, pc)))


def _pick_tile(n, candidates):
    for c in candidates:
        if n % c == 0:
            return c
    return n


# ----------------------------------------------------------------------------
# Path 1: fully VMEM-resident fused kernel (both GCN layers in one pallas_call).
# ----------------------------------------------------------------------------
def _make_fused_kernel(dp, hp, op):
    def kernel(a_ref, inv_ref, x_ref, w_ref, b_ref, o_ref):
        # int8 {0,1} adjacency -> bf16 (exact); cast via f32 (cheap VPU convert).
        a = a_ref[...].astype(jnp.float32).astype(jnp.bfloat16)      # (Np, Np)
        inv = inv_ref[...]                                            # (Np, 1) f32
        w1t = w_ref[:dp, :hp]                                         # (Dp, Hp) bf16
        w2t = w_ref[:hp, hp:hp + op]                                  # (Hp, Op) bf16
        b1 = b_ref[0:1, :hp]                                          # (1, Hp)  f32
        b2 = b_ref[1:2, :op]                                          # (1, Op)  f32

        # Layer 1: relu(((A @ X) @ W1t) * inv + b1).  (A@X)@W1t order kept: IN <= HIDDEN.
        z1 = jnp.dot(a, x_ref[...], preferred_element_type=jnp.float32)
        h1 = jnp.dot(z1.astype(jnp.bfloat16), w1t, preferred_element_type=jnp.float32)
        h1 = jnp.maximum(h1 * inv + b1, 0.0)

        # Layer 2 (reassociated): relu((A @ (h1 @ W2t)) * inv + b2).  OUT < HIDDEN ->
        # the weight matmul goes first and the N^2 term shrinks.
        p = jnp.dot(h1.astype(jnp.bfloat16), w2t, preferred_element_type=jnp.float32)
        z2 = jnp.dot(a, p.astype(jnp.bfloat16), preferred_element_type=jnp.float32)
        o_ref[...] = jnp.maximum(z2 * inv + b2, 0.0).astype(o_ref.dtype)

    return kernel


def _graph_gcn_fused(a_i8, inv_p, x_bf, w_pack, b_pack, np_, dp, hp, op,
                     n, d_in, hidden, d_out, vmem_est):
    vmem = pl.BlockSpec(memory_space=pltpu.MemorySpace.VMEM)
    # Cost estimate from TRUE (unpadded) dims (advisory for XLA scheduling).
    flops = (2 * n * n * d_in + 2 * n * d_in * hidden
             + 2 * n * hidden * d_out + 2 * n * n * d_out)
    bytes_accessed = (n * n + n * 4 + n * d_in * 2
                      + (d_in * hidden + hidden * d_out) * 2
                      + (hidden + d_out) * 4 + n * d_out * 4)
    vmem_limit = int(min(max(1.5 * vmem_est, 32 * 2**20) + 8 * 2**20, 60 * 2**20))
    return pl.pallas_call(
        _make_fused_kernel(dp, hp, op),
        out_shape=jax.ShapeDtypeStruct((np_, op), jnp.float32),
        in_specs=[vmem] * 5,
        out_specs=vmem,
        compiler_params=pltpu.CompilerParams(vmem_limit_bytes=vmem_limit),
        cost_estimate=pl.CostEstimate(flops=flops, transcendentals=0,
                                      bytes_accessed=bytes_accessed),
    )(a_i8, inv_p, x_bf, w_pack, b_pack)


# ----------------------------------------------------------------------------
# Path 2: two-pass row/K-tiled kernels for large N (h1 @ W2^T as bf16 HBM
# intermediate; A is read exactly twice, which is the HBM roofline).
# ----------------------------------------------------------------------------
def gcn_layer1_kernel(a_ref, x_ref, inv_ref, w1_ref, b1_ref, w2_ref, p_ref, acc_ref):
    """p = relu(((A @ X) @ W1t) * inv + b1) @ W2t, tiled over (row, neighbor-K)."""
    @pl.when(pl.program_id(1) == 0)
    def _():
        acc_ref[...] = jnp.zeros_like(acc_ref)

    a = a_ref[...].astype(jnp.float32).astype(jnp.bfloat16)
    acc_ref[...] += jnp.dot(a, x_ref[...], preferred_element_type=jnp.float32)

    @pl.when(pl.program_id(1) == pl.num_programs(1) - 1)
    def _():
        h1 = jnp.dot(acc_ref[...].astype(jnp.bfloat16), w1_ref[...],
                     preferred_element_type=jnp.float32)
        h1 = jnp.maximum(h1 * inv_ref[...] + b1_ref[...], 0.0)
        p_ref[...] = jnp.dot(h1.astype(jnp.bfloat16), w2_ref[...],
                             preferred_element_type=jnp.float32).astype(p_ref.dtype)


def gcn_layer2_kernel(a_ref, p_ref, inv_ref, b2_ref, o_ref, acc_ref):
    """out = relu((A @ p) * inv + b2), tiled over (row, neighbor-K)."""
    @pl.when(pl.program_id(1) == 0)
    def _():
        acc_ref[...] = jnp.zeros_like(acc_ref)

    a = a_ref[...].astype(jnp.float32).astype(jnp.bfloat16)
    acc_ref[...] += jnp.dot(a, p_ref[...], preferred_element_type=jnp.float32)

    @pl.when(pl.program_id(1) == pl.num_programs(1) - 1)
    def _():
        o_ref[...] = jnp.maximum(acc_ref[...] * inv_ref[...] + b2_ref[...],
                                 0.0).astype(o_ref.dtype)


def _graph_gcn_tiled(a_i8, inv_p, x_bf, w1t_bf, b1_p, w2t_bf, b2_p,
                     n, d_in, hidden, d_out, tile_m=None, tile_k=None):
    np_, dp = x_bf.shape
    hp = w1t_bf.shape[1]
    op = w2t_bf.shape[1]
    # MXU-sized tiles: 256 on the row dim and up to 512 on the neighbor/contraction
    # dim where the padded node count allows (2x256^2 MXU on v6e/v7x); 128 otherwise.
    tm = tile_m or _pick_tile(np_, (256, 128))
    tk = tile_k or _pick_tile(np_, (512, 256, 128))

    # Row tiles "parallel" (sharded across the 2 TensorCores on v7x), K-reduction last.
    sem = ("parallel", "arbitrary")

    def vmem_limit(block_bytes):
        return int(min(max(2 * block_bytes, 32 * 2**20), 60 * 2**20))

    # ---- pass 1 ------------------------------------------------------------
    l1_blocks = ((tm * tk + tk * dp * 2 + tm * 4 + dp * hp * 2 + hp * 4
                  + hp * op * 2 + tm * op * 2) * 2 + tm * dp * 4)
    p = pl.pallas_call(
        gcn_layer1_kernel,
        out_shape=jax.ShapeDtypeStruct((np_, op), jnp.bfloat16),
        grid_spec=pltpu.PrefetchScalarGridSpec(
            num_scalar_prefetch=0,
            grid=(np_ // tm, np_ // tk),
            in_specs=[
                pl.BlockSpec((tm, tk), lambda i, k: (i, k)),   # A row/K tile (int8)
                pl.BlockSpec((tk, dp), lambda i, k: (k, 0)),   # X K tile
                pl.BlockSpec((tm, 1), lambda i, k: (i, 0)),    # inv row tile
                pl.BlockSpec((dp, hp), lambda i, k: (0, 0)),   # W1^T (resident)
                pl.BlockSpec((1, hp), lambda i, k: (0, 0)),    # b1
                pl.BlockSpec((hp, op), lambda i, k: (0, 0)),   # W2^T (resident)
            ],
            out_specs=pl.BlockSpec((tm, op), lambda i, k: (i, 0)),
            scratch_shapes=[pltpu.VMEM((tm, dp), jnp.float32)]),
        compiler_params=pltpu.CompilerParams(
            dimension_semantics=sem, vmem_limit_bytes=vmem_limit(l1_blocks)),
        cost_estimate=pl.CostEstimate(
            flops=2 * n * n * d_in + 2 * n * d_in * hidden + 2 * n * hidden * d_out,
            transcendentals=0,
            bytes_accessed=(n * n + n * d_in * 2 + n * 4 + d_in * hidden * 2
                            + hidden * 4 + hidden * d_out * 2 + n * d_out * 2)),
    )(a_i8, x_bf, inv_p, w1t_bf, b1_p, w2t_bf)

    # ---- pass 2 ------------------------------------------------------------
    l2_blocks = ((tm * tk + tk * op * 2 + tm * 4 + op * 4 + tm * op * 4) * 2
                 + tm * op * 4)
    out = pl.pallas_call(
        gcn_layer2_kernel,
        out_shape=jax.ShapeDtypeStruct((np_, op), jnp.float32),
        grid_spec=pltpu.PrefetchScalarGridSpec(
            num_scalar_prefetch=0,
            grid=(np_ // tm, np_ // tk),
            in_specs=[
                pl.BlockSpec((tm, tk), lambda i, k: (i, k)),   # A row/K tile (int8)
                pl.BlockSpec((tk, op), lambda i, k: (k, 0)),   # p K tile (bf16)
                pl.BlockSpec((tm, 1), lambda i, k: (i, 0)),    # inv row tile
                pl.BlockSpec((1, op), lambda i, k: (0, 0)),    # b2
            ],
            out_specs=pl.BlockSpec((tm, op), lambda i, k: (i, 0)),
            scratch_shapes=[pltpu.VMEM((tm, op), jnp.float32)]),
        compiler_params=pltpu.CompilerParams(
            dimension_semantics=sem, vmem_limit_bytes=vmem_limit(l2_blocks)),
        cost_estimate=pl.CostEstimate(
            flops=2 * n * n * d_out, transcendentals=0,
            bytes_accessed=n * n + n * d_out * 2 + n * 4 + d_out * 4 + n * d_out * 4),
    )(a_i8, p, inv_p, b2_p)
    return out


# ----------------------------------------------------------------------------
# Public wrapper
# ----------------------------------------------------------------------------
def graph_gcn(a_bin, inv_deg, x, w1, b1, w2, b2, *,
              force_tiled=False, tile_m=None, tile_k=None):
    """a_bin: (N,N) {0,1} adjacency, A[v,u]=1 iff edge u->v; inv_deg: (N,1) f32
    1/in_degree (0 for isolated nodes); x: (N,Din) f32;
    w1: (HIDDEN,Din), b1: (HIDDEN,), w2: (OUT,HIDDEN), b2: (OUT,)  (PyTorch Linear)."""
    n, d_in = x.shape
    hidden = w1.shape[0]
    d_out = w2.shape[0]

    np_ = _round_up(n, LANE)      # lane-dense adjacency / inv / output rows
    dp = _round_up(d_in, LANE)
    hp = _round_up(hidden, LANE)
    op = _round_up(d_out, LANE)

    # Exact zero padding: padded A rows/cols are 0, padded inv entries are 0,
    # padded feature lanes are 0; padded rows/lanes are sliced off at the end.
    a_i8 = _pad2d(a_bin, rows=np_, cols=np_).astype(jnp.int8)         # 0/1 exact
    inv_p = _pad2d(inv_deg.astype(jnp.float32), rows=np_)             # (Np, 1)
    x_bf = _pad2d(x, rows=np_, cols=dp).astype(jnp.bfloat16)          # (Np, Dp)
    w1t_bf = _pad2d(w1.T, rows=dp, cols=hp).astype(jnp.bfloat16)      # (Dp, Hp)
    w2t_bf = _pad2d(w2.T, rows=hp, cols=op).astype(jnp.bfloat16)      # (Hp, Op)
    b1_p = _pad2d(b1.reshape(1, hidden), cols=hp).astype(jnp.float32)
    b2_p = _pad2d(b2.reshape(1, d_out), cols=op).astype(jnp.float32)

    # VMEM footprint of the fully-resident fused path (operands + f32 intermediates).
    vmem_est = (np_ * np_ * (1 + 2) + np_ * dp * 2
                + dp * hp * 2 + hp * op * 2 + 8 * max(hp, op) * 4 + np_ * 4
                + np_ * (dp + hp + 2 * op) * 4 + np_ * op * 4)

    if force_tiled or vmem_est > FUSED_VMEM_BUDGET:
        out_p = _graph_gcn_tiled(a_i8, inv_p, x_bf, w1t_bf, b1_p, w2t_bf, b2_p,
                                 n, d_in, hidden, d_out, tile_m, tile_k)
    else:
        # Coalesce small operands (fewer DMA descriptors on the overhead-bound path):
        # W1^T | W2^T into one bf16 slab, b1 / b2 into one (8, bp) f32 slab.
        rp, bp = max(dp, hp), max(hp, op)
        w_pack = jnp.zeros((rp, hp + op), jnp.float32)
        w_pack = w_pack.at[:d_in, :hidden].set(w1.T)
        w_pack = w_pack.at[:hidden, hp:hp + d_out].set(w2.T)
        w_pack = w_pack.astype(jnp.bfloat16)
        b_pack = jnp.zeros((8, bp), jnp.float32)
        b_pack = b_pack.at[0, :hidden].set(b1)
        b_pack = b_pack.at[1, :d_out].set(b2)
        out_p = _graph_gcn_fused(a_i8, inv_p, x_bf, w_pack, b_pack, np_, dp, hp, op,
                                 n, d_in, hidden, d_out, vmem_est)
    return out_p[:n, :d_out]


def xavier_normal(key, shape_out_in):
    fan_out, fan_in = shape_out_in
    std = (2.0 / (fan_in + fan_out)) ** 0.5
    return std * jax.random.normal(key, shape_out_in, dtype=jnp.float32)


if __name__ == "__main__":
    key = jax.random.PRNGKey(0)

    N = 200          # deliberately NOT a multiple of 128: exercises the node padding
    IN_DIM = 16
    HIDDEN = 32
    OUT_DIM = 8

    k_edges, k_x, k_w1, k_b1, k_w2, k_b2 = jax.random.split(key, 6)

    # Deterministic random graph: dense binary adjacency A[v, u] = 1 iff edge u -> v,
    # with self-loops so no node has zero in-degree (DGL mean-reduce semantics).
    a_bin = (jax.random.uniform(k_edges, (N, N)) < 0.3).astype(jnp.float32)
    a_bin = jnp.maximum(a_bin, jnp.eye(N, dtype=jnp.float32))
    in_deg = jnp.sum(a_bin, axis=1, keepdims=True)
    inv_deg = jnp.where(in_deg > 0, 1.0 / jnp.maximum(in_deg, 1.0), 0.0)   # (N,1) f32

    # Node features and parameters (PyTorch Linear layout: weight (out, in)).
    x = jax.random.normal(k_x, (N, IN_DIM), dtype=jnp.float32)
    w1 = xavier_normal(k_w1, (HIDDEN, IN_DIM))
    b1 = 0.01 * jax.random.normal(k_b1, (HIDDEN,), dtype=jnp.float32)
    w2 = xavier_normal(k_w2, (OUT_DIM, HIDDEN))
    b2 = 0.01 * jax.random.normal(k_b2, (OUT_DIM,), dtype=jnp.float32)

    # 1) VMEM-resident fused path (auto-selected at this size).
    out_fused = jax.block_until_ready(graph_gcn(a_bin, inv_deg, x, w1, b1, w2, b2))
    # 2) Two-pass row/K-tiled path, small tiles forced so the grid actually iterates
    #    (N=200 -> Np=256, tm=tk=128 -> 2x2 grid per pass, parallel row axis).
    out_tiled = jax.block_until_ready(
        graph_gcn(a_bin, inv_deg, x, w1, b1, w2, b2,
                  force_tiled=True, tile_m=128, tile_k=128))

    # Pure-JAX reference with the same bf16/f32 dtype path as the kernels (tight check).
    a_bf = a_bin.astype(jnp.bfloat16)
    x_bf16 = x.astype(jnp.bfloat16)
    z1 = jnp.dot(a_bf, x_bf16, preferred_element_type=jnp.float32)
    h1 = jnp.maximum(jnp.dot(z1.astype(jnp.bfloat16), w1.T.astype(jnp.bfloat16),
                             preferred_element_type=jnp.float32) * inv_deg + b1, 0.0)
    p = jnp.dot(h1.astype(jnp.bfloat16), w2.T.astype(jnp.bfloat16),
                preferred_element_type=jnp.float32)
    z2 = jnp.dot(a_bf, p.astype(jnp.bfloat16), preferred_element_type=jnp.float32)
    ref_bf16 = jnp.maximum(z2 * inv_deg + b2, 0.0)

    # Full-precision f32 reference (loose sanity check; bf16 matmuls round slightly).
    a_norm = a_bin * inv_deg
    h1_f = jnp.maximum(a_norm @ x @ w1.T + b1, 0.0)
    ref_f32 = jnp.maximum(a_norm @ h1_f @ w2.T + b2, 0.0)

    assert jnp.allclose(out_fused, ref_bf16, atol=2e-3, rtol=2e-3), "fused vs bf16 ref"
    assert jnp.allclose(out_tiled, ref_bf16, atol=2e-3, rtol=2e-3), "tiled vs bf16 ref"
    assert jnp.allclose(out_fused, ref_f32, atol=1e-1, rtol=1e-1), "fused vs f32 ref"
    assert jnp.allclose(out_tiled, ref_f32, atol=1e-1, rtol=1e-1), "tiled vs f32 ref"

    print("KERNEL_OK")
</pallas_src>

<mosaic_0001>
module attributes {stable_mosaic.version = 11 : i64} {
  func.func @kernel(%arg0: memref<256x256xi8, #tpu.memory_space<vmem>>, %arg1: memref<256x1xf32, #tpu.memory_space<vmem>>, %arg2: memref<256x128xbf16, #tpu.memory_space<vmem>>, %arg3: memref<128x256xbf16, #tpu.memory_space<vmem>>, %arg4: memref<8x128xf32, #tpu.memory_space<vmem>>, %arg5: memref<256x128xf32, #tpu.memory_space<vmem>>) attributes {dimension_semantics = [], scalar_prefetch = 0 : i64, scratch_operands = 0 : i64, tpu.core_type = #tpu.core_type<tc>} {
    %c0 = arith.constant 0 : index
    %c0_0 = arith.constant 0 : index
    %0 = vector.load %arg0[%c0, %c0_0] : memref<256x256xi8, #tpu.memory_space<vmem>>, vector<256x256xi8>
    %1 = arith.sitofp %0 : vector<256x256xi8> to vector<256x256xf32>
    %2 = arith.truncf %1 : vector<256x256xf32> to vector<256x256xbf16>
    %c0_1 = arith.constant 0 : index
    %c0_2 = arith.constant 0 : index
    %3 = vector.load %arg1[%c0_1, %c0_2] : memref<256x1xf32, #tpu.memory_space<vmem>>, vector<256x1xf32>
    %c0_3 = arith.constant 0 : index
    %c0_4 = arith.constant 0 : index
    %4 = vector.load %arg3[%c0_3, %c0_4] : memref<128x256xbf16, #tpu.memory_space<vmem>>, vector<128x128xbf16>
    %c0_5 = arith.constant 0 : index
    %c128 = arith.constant 128 : index
    %5 = vector.load %arg3[%c0_5, %c128] : memref<128x256xbf16, #tpu.memory_space<vmem>>, vector<128x128xbf16>
    %c0_6 = arith.constant 0 : index
    %c0_7 = arith.constant 0 : index
    %6 = vector.load %arg4[%c0_6, %c0_7] : memref<8x128xf32, #tpu.memory_space<vmem>>, vector<1x128xf32>
    %c1 = arith.constant 1 : index
    %c0_8 = arith.constant 0 : index
    %7 = vector.load %arg4[%c1, %c0_8] : memref<8x128xf32, #tpu.memory_space<vmem>>, vector<1x128xf32>
    %c0_9 = arith.constant 0 : index
    %c0_10 = arith.constant 0 : index
    %8 = vector.load %arg2[%c0_9, %c0_10] : memref<256x128xbf16, #tpu.memory_space<vmem>>, vector<256x128xbf16>
    %cst = arith.constant dense<0.000000e+00> : vector<256x128xf32>
    %9 = tpu.matmul %2, %8, %cst {dimension_numbers = #tpu.dot_dimension_numbers<[1], [0], [0], [1], [0, 0, 1, 1], [], []>} : vector<256x256xbf16>, vector<256x128xbf16>, vector<256x128xf32> -> vector<256x128xf32>
    %10 = arith.truncf %9 : vector<256x128xf32> to vector<256x128xbf16>
    %cst_11 = arith.constant dense<0.000000e+00> : vector<256x128xf32>
    %11 = tpu.matmul %10, %4, %cst_11 {dimension_numbers = #tpu.dot_dimension_numbers<[1], [0], [0], [1], [0, 0, 1, 1], [], []>} : vector<256x128xbf16>, vector<128x128xbf16>, vector<256x128xf32> -> vector<256x128xf32>
    %12 = vector.broadcast %3 : vector<256x1xf32> to vector<256x128xf32>
    %13 = arith.mulf %11, %12 : vector<256x128xf32>
    %14 = vector.broadcast %6 : vector<1x128xf32> to vector<256x128xf32>
    %15 = arith.addf %13, %14 : vector<256x128xf32>
    %cst_12 = arith.constant 0.000000e+00 : f32
    %16 = vector.broadcast %cst_12 : f32 to vector<256x128xf32>
    %17 = arith.maximumf %15, %16 : vector<256x128xf32>
    %18 = arith.truncf %17 : vector<256x128xf32> to vector<256x128xbf16>
    %cst_13 = arith.constant dense<0.000000e+00> : vector<256x128xf32>
    %19 = tpu.matmul %18, %5, %cst_13 {dimension_numbers = #tpu.dot_dimension_numbers<[1], [0], [0], [1], [0, 0, 1, 1], [], []>} : vector<256x128xbf16>, vector<128x128xbf16>, vector<256x128xf32> -> vector<256x128xf32>
    %20 = arith.truncf %19 : vector<256x128xf32> to vector<256x128xbf16>
    %cst_14 = arith.constant dense<0.000000e+00> : vector<256x128xf32>
    %21 = tpu.matmul %2, %20, %cst_14 {dimension_numbers = #tpu.dot_dimension_numbers<[1], [0], [0], [1], [0, 0, 1, 1], [], []>} : vector<256x256xbf16>, vector<256x128xbf16>, vector<256x128xf32> -> vector<256x128xf32>
    %22 = vector.broadcast %3 : vector<256x1xf32> to vector<256x128xf32>
    %23 = arith.mulf %21, %22 : vector<256x128xf32>
    %24 = vector.broadcast %7 : vector<1x128xf32> to vector<256x128xf32>
    %25 = arith.addf %23, %24 : vector<256x128xf32>
    %cst_15 = arith.constant 0.000000e+00 : f32
    %26 = vector.broadcast %cst_15 : f32 to vector<256x128xf32>
    %27 = arith.maximumf %25, %26 : vector<256x128xf32>
    %c0_16 = arith.constant 0 : index
    %c0_17 = arith.constant 0 : index
    %28 = vector.load %arg5[%c0_16, %c0_17] : memref<256x128xf32, #tpu.memory_space<vmem>>, vector<256x128xf32>
    tpu.vector_store %arg5[%c0_16, %c0_17], %27 {strides = array<i32>} : memref<256x128xf32, #tpu.memory_space<vmem>>, vector<256x128xf32>,
    return
  }
}

</mosaic_0001>

<bundles_post_ra>
// kernel: tpu_custom_call.1
= control target key start
LH: loop header
LB: loop body
LE: loop exit
PB: predicated region body
PF: predicated region fallthrough
CT: control target
= control target key end

     0   :  { %10 = vsyncpa [#allocation3], 0  ;;  %s2463_s0 = inlined_call_operand.vmem [shape: s8[256,256], index: 0, kind: input, shape index: {}]   ;;  %s2464_s1 = inlined_call_operand.vmem [shape: f32[256,1], index: 1, kind: input, shape index: {}]   ;;  %s2465_s2 = inlined_call_operand.vmem [shape: bf16[256,128], index: 2, kind: input, shape index: {}]   ;;  %s2466_s3 = inlined_call_operand.hbm [shape: bf16[128,256], index: 3, kind: input, shape index: {}]   ;;  %s2467_s4 = inlined_call_operand.hbm [shape: f32[8,128], index: 4, kind: input, shape index: {}]   ;;  %s2468_s5 = inlined_call_operand.hbm [shape: f32[256,128], index: 5, kind: output, shape index: {}]  }
   0x1   :  { %11 = vsyncpa [#allocation6], 0 }
   0x2   :  { %12 = vsyncpa [#allocation4], 0  ;;  %s23_s20 = sshll.u32 %s2466_s3, 4  ;;  %s1770_s21 = smov [#allocation2]   ;;  %s24_s20 = int_to_ptr.hbm [resolvable:$true] %s23_s20 }
   0x3   :  { %s25_s22 = sshll.u32 %s1770_s21, 4  ;;  %s37_s25 = sshll.u32 %s2467_s4, 4  ;;  %s26_s22 = int_to_ptr.vmem [resolvable:$true] %s25_s22  ;;  %s38_s25 = int_to_ptr.hbm [resolvable:$true] %s37_s25 }
   0x4   :  { %s1771_s26 = smov 128   ;;  %s1772_s27 = smov 8  }
   0x5   :  { %31 = dma.hbm_to_vmem [thread:$0]  %s24_s20, 2048, %s26_s22, [#allocation3], %s1771_s26, %s1771_s26, %s1772_s27  }
   0x6   :  { %s1773_s28 = smov [#allocation5]  }
   0x7   :  { %s39_s29 = sshll.u32 %s1773_s28, 4  ;;  %s40_s29 = int_to_ptr.vmem [resolvable:$true] %s39_s29 }
   0x8   :  { %42 = dma.hbm_to_vmem [thread:$0]  %s38_s25, 128, %s40_s29, [#allocation6]  }
   0x9   :  { %1764 = dma.done.wait [#allocation3], 2048  }
   0xa   :  { %1765 = vsyncadd [#allocation3], 4294965248 }
   0xb   :  { %1766 = dma.done.wait [#allocation6], 128  }
   0xc   :  { %1767 = vsyncadd [#allocation6], 4294967168  ;;  %v1656_v0 = vld [vmem:[%s2465_s2 + $0x38] sm:$0xff]  ;;  %v1655_v2 = vld [vmem:[%s2465_s2 + $0x30] sm:$0xff]  ;;  %s1491_s3 = sshll.u32 %s2468_s5, 4  ;;  %s1492_s3 = int_to_ptr.hbm [resolvable:$true] %s1491_s3 }
   0xd   :  { %v1664_v1 = vld [vmem:[%s2465_s2 + $0x78] sm:$0xff]  ;;  %421 = vmatpush.bf16.msra.mxu0 %v1656_v0  ;;  %v1663_v3 = vld [vmem:[%s2465_s2 + $0x70] sm:$0xff]  ;;  %1665 = vmatpush.bf16.msra.mxu2 %v1656_v0  ;;  %v1654_v4 = vld [vmem:[%s2465_s2 + $0x28] sm:$0xff] }
   0xe   :  { %510 = vmatpush.bf16.msra.mxu1 %v1664_v1  ;;  %1673 = vmatpush.bf16.msra.mxu3 %v1664_v1  ;;  %v1662_v5 = vld [vmem:[%s2465_s2 + $0x68] sm:$0xff]  ;;  %v1653_v6 = vld [vmem:[%s2465_s2 + $0x20] sm:$0xff]  ;;  %v1652_v8 = vld [vmem:[%s2465_s2 + $0x18] sm:$0xff] }
   0xf   :  { %v1661_v7 = vld [vmem:[%s2465_s2 + $0x60] sm:$0xff]  ;;  %v1660_v9 = vld [vmem:[%s2465_s2 + $0x58] sm:$0xff]  ;;  %v1651_v10 = vld [vmem:[%s2465_s2 + $0x10] sm:$0xff] }
  0x10   :  { %v1659_v11 = vld [vmem:[%s2465_s2 + $0x50] sm:$0xff]  ;;  %v51_v12 = vld [vmem:[%s2463_s0] sm:$0xff]  ;;  %v52_v13 = vld [vmem:[%s2463_s0 + $0x8] sm:$0xff] }
  0x11   :  { %422 = vmatpush.bf16.msra.mxu0 %v1655_v2  ;;  %1666 = vmatpush.bf16.msra.mxu2 %v1655_v2  ;;  %v59_v14 = vld [vmem:[%s2463_s0 + $0x40] sm:$0xff]  ;;  %v60_v15 = vld [vmem:[%s2463_s0 + $0x48] sm:$0xff]  ;;  %v67_v16 = vunpack.c.0.s8 %v51_v12  ;;  %v69_v17 = vunpack.c.1.s8 %v51_v12  ;;  %v68_v18 = vunpack.c.0.s8 %v52_v13  ;;  %v70_v19 = vunpack.c.1.s8 %v52_v13  ;;  %v53_v60 = vld [vmem:[%s2463_s0 + $0x10] sm:$0xff] }
  0x12   :  { %511 = vmatpush.bf16.msra.mxu1 %v1663_v3  ;;  %1674 = vmatpush.bf16.msra.mxu3 %v1663_v3  ;;  %v1650_v20 = vld [vmem:[%s2465_s2 + $0x8] sm:$0xff]  ;;  %v99_v22 = vunpack.c.0.s8 %v59_v14  ;;  %v101_v23 = vunpack.c.1.s8 %v59_v14  ;;  %v100_v24 = vunpack.c.0.s8 %v60_v15  ;;  %v102_v25 = vunpack.c.1.s8 %v60_v15  ;;  %v1649_v30 = vld [vmem:[%s2465_s2] sm:$0xff]  ;;  %v54_v61 = vld [vmem:[%s2463_s0 + $0x18] sm:$0xff] }
  0x13   :  { %v1658_v21 = vld [vmem:[%s2465_s2 + $0x48] sm:$0xff]  ;;  %v131_v26 = vcvt.s32.f32 %v67_v16  ;;  %v133_v27 = vcvt.s32.f32 %v69_v17  ;;  %v132_v28 = vcvt.s32.f32 %v68_v18  ;;  %v134_v29 = vcvt.s32.f32 %v70_v19  ;;  %v1657_v31 = vld [vmem:[%s2465_s2 + $0x40] sm:$0xff]  ;;  %v61_v62 = vld [vmem:[%s2463_s0 + $0x50] sm:$0xff] }
  0x14   :  { %v163_v32 = vcvt.s32.f32 %v99_v22  ;;  %v165_v33 = vcvt.s32.f32 %v101_v23  ;;  %v164_v34 = vcvt.s32.f32 %v100_v24  ;;  %v166_v35 = vcvt.s32.f32 %v102_v25  ;;  %v62_v63 = vld [vmem:[%s2463_s0 + $0x58] sm:$0xff] }
  0x15   :  { %423 = vmatpush.bf16.msra.mxu0 %v1654_v4  ;;  %1667 = vmatpush.bf16.msra.mxu2 %v1654_v4  ;;  %v1875_v36 = vpack.c.bf16 %v133_v27, %v131_v26  ;;  %v1877_v37 = vpack.c.bf16 %v134_v29, %v132_v28  ;;  %v71_v40 = vunpack.c.2.s8 %v51_v12  ;;  %v73_v41 = vunpack.c.3.s8 %v51_v12 }
  0x16   :  { %512 = vmatpush.bf16.msra.mxu1 %v1662_v5  ;;  %1675 = vmatpush.bf16.msra.mxu3 %v1662_v5  ;;  %v1879_v38 = vpack.c.bf16 %v165_v33, %v163_v32  ;;  %v1881_v39 = vpack.c.bf16 %v166_v35, %v164_v34  ;;  %v72_v42 = vunpack.c.2.s8 %v52_v13  ;;  %v74_v43 = vunpack.c.3.s8 %v52_v13 }
  0x17   :  { %v103_v44 = vunpack.c.2.s8 %v59_v14  ;;  %v105_v45 = vunpack.c.3.s8 %v59_v14  ;;  %v104_v46 = vunpack.c.2.s8 %v60_v15  ;;  %v106_v47 = vunpack.c.3.s8 %v60_v15 }
  0x18   :  { %v135_v48 = vcvt.s32.f32 %v71_v40  ;;  %v137_v49 = vcvt.s32.f32 %v73_v41  ;;  %v136_v50 = vcvt.s32.f32 %v72_v42  ;;  %v138_v51 = vcvt.s32.f32 %v74_v43 }
  0x19   :  { %424 = vmatpush.bf16.msra.mxu0 %v1653_v6  ;;  %1668 = vmatpush.bf16.msra.mxu2 %v1653_v6  ;;  %v167_v52 = vcvt.s32.f32 %v103_v44  ;;  %v169_v53 = vcvt.s32.f32 %v105_v45  ;;  %v168_v54 = vcvt.s32.f32 %v104_v46  ;;  %v170_v55 = vcvt.s32.f32 %v106_v47  ;;  %v55_v46 = vld [vmem:[%s2463_s0 + $0x20] sm:$0xff]  ;;  %v56_v47 = vld [vmem:[%s2463_s0 + $0x28] sm:$0xff] }
  0x1a   :  { %513 = vmatpush.bf16.msra.mxu1 %v1661_v7  ;;  %1676 = vmatpush.bf16.msra.mxu3 %v1661_v7  ;;  %v1887_v56 = vpack.c.bf16 %v137_v49, %v135_v48  ;;  %v1889_v57 = vpack.c.bf16 %v138_v51, %v136_v50  ;;  %v75_v0 = vunpack.c.0.s8 %v53_v60  ;;  %v77_v1 = vunpack.c.1.s8 %v53_v60  ;;  %v228_v48 = vld [vmem:[%s2464_s1 + $0x8] sm:$0xff]  ;;  %v229_v49 = vld [vmem:[%s2464_s1 + $0x10] sm:$0xff]  ;;  %v63_v50 = vld [vmem:[%s2463_s0 + $0x60] sm:$0xff] }
  0x1b   :  { %v1891_v58 = vpack.c.bf16 %v169_v53, %v167_v52  ;;  %v1893_v59 = vpack.c.bf16 %v170_v55, %v168_v54  ;;  %v76_v2 = vunpack.c.0.s8 %v54_v61  ;;  %v78_v3 = vunpack.c.1.s8 %v54_v61  ;;  %v64_v51 = vld [vmem:[%s2463_s0 + $0x68] sm:$0xff] }
  0x1c   :  { %v107_v4 = vunpack.c.0.s8 %v61_v62  ;;  %v109_v5 = vunpack.c.1.s8 %v61_v62  ;;  %v108_v6 = vunpack.c.0.s8 %v62_v63  ;;  %v110_v7 = vunpack.c.1.s8 %v62_v63 }
  0x1d   :  { %425 = vmatpush.bf16.msra.mxu0 %v1652_v8  ;;  %1669 = vmatpush.bf16.msra.mxu2 %v1652_v8  ;;  %v139_v8 = vcvt.s32.f32 %v75_v0  ;;  %v79_v22 = vunpack.c.2.s8 %v53_v60  ;;  %v81_v23 = vunpack.c.3.s8 %v53_v60  ;;  %v80_v24 = vunpack.c.2.s8 %v54_v61  ;;  %v233_v0 = vld [vmem:[%s2464_s1 + $0x30] sm:$0xff] }
  0x1e   :  { %514 = vmatpush.bf16.msra.mxu1 %v1660_v9  ;;  %1677 = vmatpush.bf16.msra.mxu3 %v1660_v9  ;;  %v141_v9 = vcvt.s32.f32 %v77_v1  ;;  %v171_v12 = vcvt.s32.f32 %v107_v4  ;;  %v173_v13 = vcvt.s32.f32 %v109_v5  ;;  %v172_v14 = vcvt.s32.f32 %v108_v6 }
  0x1f   :  { %v174_v15 = vcvt.s32.f32 %v110_v7  ;;  %v82_v25 = vunpack.c.3.s8 %v54_v61  ;;  %v111_v26 = vunpack.c.2.s8 %v61_v62  ;;  %v113_v27 = vunpack.c.3.s8 %v61_v62 }
  0x20   :  { %v1911_v16 = vpack.c.bf16 %v141_v9, %v139_v8  ;;  %v1915_v18 = vpack.c.bf16 %v173_v13, %v171_v12  ;;  %v112_v28 = vunpack.c.2.s8 %v62_v63  ;;  %v114_v29 = vunpack.c.3.s8 %v62_v63  ;;  %v230_v13 = vld [vmem:[%s2464_s1 + $0x18] sm:$0xff] }
  0x21   :  { %426 = vmatpush.bf16.msra.mxu0 %v1651_v10  ;;  %1670 = vmatpush.bf16.msra.mxu2 %v1651_v10  ;;  %v140_v10 = vcvt.s32.f32 %v76_v2  ;;  %v1917_v19 = vpack.c.bf16 %v174_v15, %v172_v14  ;;  %v144_v32 = vcvt.s32.f32 %v80_v24  ;;  %v146_v33 = vcvt.s32.f32 %v82_v25  ;;  %v236_v14 = vld [vmem:[%s2464_s1 + $0x48] sm:$0xff]  ;;  %v1599_v15 = vld [vmem:[#allocation2 + $0x70] sm:$0xf] }
  0x22   :  { %515 = vmatpush.bf16.msra.mxu1 %v1659_v11  ;;  %1678 = vmatpush.bf16.msra.mxu3 %v1659_v11  ;;  %v142_v11 = vcvt.s32.f32 %v78_v3  ;;  %v175_v34 = vcvt.s32.f32 %v111_v26  ;;  %v177_v35 = vcvt.s32.f32 %v113_v27  ;;  %v176_v40 = vcvt.s32.f32 %v112_v28  ;;  %v1639_v24 = vld [vmem:[#allocation2 + $0x64] sm:$0xf0] }
  0x23   :  { %v178_v41 = vcvt.s32.f32 %v114_v29  ;;  %v1928_v43 = vpack.c.bf16 %v146_v33, %v144_v32  ;;  %v83_v52 = vunpack.c.0.s8 %v55_v46  ;;  %v85_v53 = vunpack.c.1.s8 %v55_v46  ;;  %v234_v33 = vld [vmem:[%s2464_s1 + $0x38] sm:$0xff] }
  0x24   :  { %v1913_v17 = vpack.c.bf16 %v142_v11, %v140_v10  ;;  %v1930_v44 = vpack.c.bf16 %v177_v35, %v175_v34  ;;  %v84_v54 = vunpack.c.0.s8 %v56_v47  ;;  %v86_v55 = vunpack.c.1.s8 %v56_v47  ;;  %v239_v34 = vld [vmem:[%s2464_s1 + $0x60] sm:$0xff] }
  0x25   :  { %427 = vmatpush.bf16.msra.mxu0 %v1650_v20  ;;  %1671 = vmatpush.bf16.msra.mxu2 %v1650_v20  ;;  %v227_v20 = vld [vmem:[%s2464_s1] sm:$0xff]  ;;  %v1932_v45 = vpack.c.bf16 %v178_v41, %v176_v40  ;;  %v115_v60 = vunpack.c.0.s8 %v63_v50  ;;  %v117_v61 = vunpack.c.1.s8 %v63_v50  ;;  %v116_v62 = vunpack.c.0.s8 %v64_v51 }
  0x26   :  { %516 = vmatpush.bf16.msra.mxu1 %v1658_v21  ;;  %1679 = vmatpush.bf16.msra.mxu3 %v1658_v21  ;;  %v1774_v21 = vmov 0   ;;  %v118_v63 = vunpack.c.1.s8 %v64_v51  ;;  %v147_v1 = vcvt.s32.f32 %v83_v52  ;;  %v149_v2 = vcvt.s32.f32 %v85_v53 }
  0x27   :  { %1687 = vset.pattern.permute.xlu0 %v1774_v21  ;;  %1688 = vset.pattern.permute.xlu1 %v1774_v21  ;;  %2498 = vst [vmem:[#allocation11_spill] sm:$0xff] %v1932_v45  ;;  %v148_v3 = vcvt.s32.f32 %v84_v54  ;;  %v150_v4 = vcvt.s32.f32 %v86_v55  ;;  %v179_v5 = vcvt.s32.f32 %v115_v60  ;;  %v181_v6 = vcvt.s32.f32 %v117_v61  ;;  %v1994_v55 = vld [vmem:[%s2463_s0 + $0x30] sm:$0xff]  ;;  %v2001_v60 = vld [vmem:[%s2463_s0 + $0x38] sm:$0xff] }
  0x28   :  { %754 = vperm.xlu0 %1687, %v227_v20   ;;  %1689 = vset.pattern.permute.xlu2 %v1774_v21  ;;  %v180_v7 = vcvt.s32.f32 %v116_v62  ;;  %v182_v8 = vcvt.s32.f32 %v118_v63  ;;  %v1959_v9 = vpack.c.bf16 %v149_v2, %v147_v1  ;;  %v1640_v20 = vld [vmem:[#allocation2 + $0x74] sm:$0xf0]  ;;  %v87_v21 = vunpack.c.2.s8 %v55_v46  ;;  %v1591_v61 = vld [vmem:[#allocation2 + $0x50] sm:$0xf]  ;;  %v1587_v2 = vld [vmem:[#allocation2 + $0x40] sm:$0xf] }
  0x29   :  { %428 = vmatpush.bf16.msra.mxu0 %v1649_v30  ;;  %1672 = vmatpush.bf16.msra.mxu2 %v1649_v30  ;;  %v143_v30 = vcvt.s32.f32 %v79_v22  ;;  %v1961_v10 = vpack.c.bf16 %v150_v4, %v148_v3  ;;  %v1963_v11 = vpack.c.bf16 %v181_v6, %v179_v5  ;;  %v1600_v22 = vor.u32 %v1640_v20, %v1599_v15  ;;  %v1638_v62 = vld [vmem:[#allocation2 + $0x54] sm:$0xf0]  ;;  %v2014_v3 = vld [vmem:[%s2463_s0 + $0x70] sm:$0xff]  ;;  %v1637_v5 = vld [vmem:[#allocation2 + $0x44] sm:$0xf0] }
  0x2a   :  { %517 = vmatpush.bf16.msra.mxu1 %v1657_v31  ;;  %1680 = vmatpush.bf16.msra.mxu3 %v1657_v31  ;;  %v145_v31 = vcvt.s32.f32 %v81_v23  ;;  %v1965_v12 = vpack.c.bf16 %v182_v8, %v180_v7  ;;  %v1595_v23 = vld [vmem:[#allocation2 + $0x60] sm:$0xf]  ;;  %v89_v25 = vunpack.c.3.s8 %v55_v46  ;;  %v88_v26 = vunpack.c.2.s8 %v56_v47  ;;  %v242_v1 = vld [vmem:[%s2464_s1 + $0x78] sm:$0xff]  ;;  %v1583_v15 = vld [vmem:[#allocation2 + $0x30] sm:$0xf] }
  0x2b   :  { %764 = vperm.xlu1 %1688, %v229_v49   ;;  %v90_v27 = vunpack.c.3.s8 %v56_v47  ;;  %v119_v28 = vunpack.c.2.s8 %v63_v50  ;;  %v121_v29 = vunpack.c.3.s8 %v63_v50  ;;  %v1596_v32 = vor.u32 %v1639_v24, %v1595_v23  ;;  %v2019_v4 = vld [vmem:[%s2463_s0 + $0x78] sm:$0xff] }
  0x2c   :  { %429 = vmatmul.bf16.vlgmr.msra.gmra.mxu0 %v1875_v36  ;;  %469 = vmatmul.bf16.vlgmr.msra.gmra.mxu2 %v1879_v38  ;;  %v1926_v42 = vpack.c.bf16 %v145_v31, %v143_v30  ;;  %2499 = vst [vmem:[#allocation12_spill] sm:$0xff] %v1965_v12  ;;  %v120_v30 = vunpack.c.2.s8 %v64_v51  ;;  %v122_v31 = vunpack.c.3.s8 %v64_v51  ;;  %v151_v35 = vcvt.s32.f32 %v87_v21  ;;  %v1636_v20 = vld [vmem:[#allocation2 + $0x34] sm:$0xf0] }
  0x2d   :  { %518 = vmatmul.bf16.vlgmr.msra.gmra.mxu1 %v1877_v37  ;;  %558 = vmatmul.bf16.vlgmr.msra.gmra.mxu3 %v1881_v39  ;;  %v153_v40 = vcvt.s32.f32 %v89_v25  ;;  %v152_v41 = vcvt.s32.f32 %v88_v26  ;;  %v154_v46 = vcvt.s32.f32 %v90_v27  ;;  %v185_v47 = vcvt.s32.f32 %v121_v29  ;;  %v240_v26 = vld [vmem:[%s2464_s1 + $0x68] sm:$0xff]  ;;  %v245_v27 = vld [vmem:[%s2464_s1 + $0x90] sm:$0xff] }
  0x2e   :  { %663 = vmatpush.bf16.msrb.mxu2 %v1600_v22  ;;  %v184_v49 = vcvt.s32.f32 %v120_v30  ;;  %v186_v50 = vcvt.s32.f32 %v122_v31  ;;  %v1592_v63 = vor.u32 %v1638_v62, %v1591_v61  ;;  %v1588_v6 = vor.u32 %v1637_v5, %v1587_v2  ;;  %v1575_v61 = vld [vmem:[#allocation2 + $0x10] sm:$0xf]  ;;  %v1634_v62 = vld [vmem:[#allocation2 + $0x14] sm:$0xf0] }
  0x2f   :  { %v1983_v51 = vpack.c.bf16 %v153_v40, %v151_v35  ;;  %v1985_v52 = vpack.c.bf16 %v154_v46, %v152_v41  ;;  %v91_v7 = vunpack.c.0.s8 %v1994_v55  ;;  %v93_v8 = vunpack.c.1.s8 %v1994_v55  ;;  %v1579_v46 = vld [vmem:[#allocation2 + $0x20] sm:$0xf] }
  0x30   :  { %759 = vperm.xlu0 %1687, %v228_v48   ;;  %v183_v48 = vcvt.s32.f32 %v119_v28  ;;  %v1989_v54 = vpack.c.bf16 %v186_v50, %v184_v49  ;;  %v123_v21 = vunpack.c.0.s8 %v2014_v3  ;;  %v125_v22 = vunpack.c.1.s8 %v2014_v3 }
  0x31   :  { %v124_v23 = vunpack.c.0.s8 %v2019_v4  ;;  %v126_v24 = vunpack.c.1.s8 %v2019_v4  ;;  %v1584_v25 = vor.u32 %v1636_v20, %v1583_v15  ;;  %v155_v28 = vcvt.s32.f32 %v91_v7 }
  0x32   :  { %664 = vmatpush.bf16.msrb.mxu2 %v1596_v32  ;;  %v1987_v53 = vpack.c.bf16 %v185_v47, %v183_v48  ;;  %2500 = vst [vmem:[#allocation13_spill] sm:$0xff] %v1989_v54  ;;  %v157_v29 = vcvt.s32.f32 %v93_v8  ;;  %v187_v32 = vcvt.s32.f32 %v123_v21  ;;  %v1635_v48 = vld [vmem:[#allocation2 + $0x24] sm:$0xf0]  ;;  %v95_v2 = vunpack.c.2.s8 %v1994_v55 }
  0x33   :  { %769 = vperm.xlu1 %1688, %v230_v13   ;;  %v92_v13 = vunpack.c.0.s8 %v2001_v60  ;;  %v190_v35 = vcvt.s32.f32 %v126_v24  ;;  %v1580_v50 = vor.u32 %v1635_v48, %v1579_v46  ;;  %v97_v5 = vunpack.c.3.s8 %v1994_v55  ;;  %v254_v46 = vld [vmem:[%s2464_s1 + $0xd8] sm:$0xff]  ;;  %v235_v48 = vld [vmem:[%s2464_s1 + $0x40] sm:$0xff] }
  0x34   :  { %v2035_v40 = vpack.c.bf16 %v157_v29, %v155_v28  ;;  %v98_v7 = vunpack.c.3.s8 %v2001_v60  ;;  %v127_v8 = vunpack.c.2.s8 %v2014_v3  ;;  %v129_v15 = vunpack.c.3.s8 %v2014_v3  ;;  %v231_v29 = vld [vmem:[%s2464_s1 + $0x20] sm:$0xff]  ;;  %v246_v3 = vld [vmem:[%s2464_s1 + $0x98] sm:$0xff] }
  0x35   :  { %v156_v30 = vcvt.s32.f32 %v92_v13  ;;  %v1571_v13 = vld [vmem:[#allocation2] sm:$0xf]  ;;  %v128_v20 = vunpack.c.2.s8 %v2019_v4  ;;  %v130_v21 = vunpack.c.3.s8 %v2019_v4  ;;  %v161_v24 = vcvt.s32.f32 %v97_v5  ;;  %774 = vperm.xlu2 %1689, %v231_v29  }
  0x36   :  { %665 = vmatpush.bf16.msrb.mxu2 %v1592_v63  ;;  %v1576_v63 = vor.u32 %v1634_v62, %v1575_v61  ;;  %v162_v55 = vcvt.s32.f32 %v98_v7  ;;  %v251_v4 = vld [vmem:[%s2464_s1 + $0xc0] sm:$0xff]  ;;  %v257_v61 = vld [vmem:[%s2464_s1 + $0xf0] sm:$0xff] }
  0x37   :  { %v192_v28 = vcvt.s32.f32 %v128_v20  ;;  %v258_v20 = vld [vmem:[%s2464_s1 + $0xf8] sm:$0xff] }
  0x38   :  { %784 = vperm.xlu0 %1687, %v233_v0   ;;  %v237_v0 = vld [vmem:[%s2464_s1 + $0x50] sm:$0xff] }
  0x3a   :  { %666 = vmatpush.bf16.msrb.mxu2 %v1588_v6  ;;  %v96_v6 = vunpack.c.2.s8 %v2001_v60 }
  0x3b   :  { %789 = vperm.xlu1 %1688, %v234_v33   ;;  %v189_v33 = vcvt.s32.f32 %v125_v22 }
  0x3c   :  { %434 = vmatmul.bf16.gmra.mxu0 %v1887_v56  ;;  %474 = vmatmul.bf16.gmra.mxu2 %v1891_v58 }
  0x3d   :  { %523 = vmatmul.bf16.gmra.mxu1 %v1889_v57  ;;  %563 = vmatmul.bf16.gmra.mxu3 %v1893_v59  ;;  %v2039_v47 = vpack.c.bf16 %v189_v33, %v187_v32 }
  0x3e   :  { %667 = vmatpush.bf16.msrb.mxu2 %v1584_v25  ;;  %v160_v25 = vcvt.s32.f32 %v96_v6 }
  0x40   :  { %799 = vperm.xlu0 %1687, %v236_v14   ;;  %v94_v14 = vunpack.c.1.s8 %v2001_v60  ;;  %v194_v60 = vcvt.s32.f32 %v130_v21 }
  0x42   :  { %v158_v31 = vcvt.s32.f32 %v94_v14  ;;  %668 = vmatpush.bf16.msrb.mxu2 %v1580_v50  ;;  %v1633_v14 = vld [vmem:[#allocation2 + $0x4] sm:$0xf0]  ;;  %v2076_v33 = vpack.c.bf16 %v194_v60, %v192_v28 }
  0x43   :  { %804 = vperm.xlu1 %1688, %v237_v0   ;;  %v243_v0 = vld [vmem:[%s2464_s1 + $0x80] sm:$0xff]  ;;  %v1572_v22 = vor.u32 %v1633_v14, %v1571_v13  ;;  %v252_v50 = vld [vmem:[%s2464_s1 + $0xc8] sm:$0xff] }
  0x44   :  { %v2037_v41 = vpack.c.bf16 %v158_v31, %v156_v30  ;;  %v2072_v31 = vpack.c.bf16 %v162_v55, %v160_v25  ;;  %2502 = vst [vmem:[#allocation15_spill] sm:$0xff] %v2076_v33 }
  0x46   :  { %669 = vmatpush.bf16.msrb.mxu2 %v1576_v63 }
  0x48   :  { %814 = vperm.xlu0 %1687, %v239_v34   ;;  %v188_v34 = vcvt.s32.f32 %v124_v23  ;;  %v159_v23 = vcvt.s32.f32 %v95_v2 }
  0x4a   :  { %v2041_v49 = vpack.c.bf16 %v190_v35, %v188_v34  ;;  %670 = vmatpush.bf16.msrb.mxu2 %v1572_v22  ;;  %v2070_v30 = vpack.c.bf16 %v161_v24, %v159_v23  ;;  %v232_v34 = vld [vmem:[%s2464_s1 + $0x28] sm:$0xff]  ;;  %v249_v35 = vld [vmem:[%s2464_s1 + $0xb0] sm:$0xff] }
  0x4b   :  { %819 = vperm.xlu1 %1688, %v240_v26   ;;  %v191_v26 = vcvt.s32.f32 %v127_v8  ;;  %779 = vperm.xlu2 %1689, %v232_v34  }
  0x4c   :  { %439 = vmatmul.bf16.gmra.mxu0 %v1911_v16  ;;  %479 = vmatmul.bf16.gmra.mxu2 %v1915_v18  ;;  %2501 = vst [vmem:[#allocation14_spill] sm:$0xff] %v2041_v49 }
  0x4d   :  { %528 = vmatmul.bf16.gmra.mxu1 %v1913_v17  ;;  %568 = vmatmul.bf16.gmra.mxu3 %v1917_v19 }
  0x50   :  { %829 = vperm.xlu0 %1687, %v242_v1   ;;  %v248_v1 = vld [vmem:[%s2464_s1 + $0xa8] sm:$0xff] }
  0x53   :  { %834 = vperm.xlu1 %1688, %v243_v0   ;;  %794 = vperm.xlu2 %1689, %v235_v48   ;;  %v238_v0 = vld [vmem:[%s2464_s1 + $0x58] sm:$0xff] }
  0x58   :  { %844 = vperm.xlu0 %1687, %v245_v27   ;;  %v193_v27 = vcvt.s32.f32 %v129_v15  ;;  %v241_v15 = vld [vmem:[%s2464_s1 + $0x70] sm:$0xff] }
  0x5a   :  { %v2074_v32 = vpack.c.bf16 %v193_v27, %v191_v26  ;;  %v244_v27 = vld [vmem:[%s2464_s1 + $0x88] sm:$0xff] }
  0x5b   :  { %849 = vperm.xlu1 %1688, %v246_v3   ;;  %809 = vperm.xlu2 %1689, %v238_v0  }
  0x5c   :  { %444 = vmatmul.bf16.gmra.mxu0 %v1926_v42  ;;  %484 = vmatmul.bf16.gmra.mxu2 %v1930_v44 }
  0x5d   :  { %533 = vmatmul.bf16.gmra.mxu1 %v1928_v43  ;;  %573 = vmatmul.bf16.gmra.mxu3 %v1932_v45 }
  0x60   :  { %859 = vperm.xlu0 %1687, %v248_v1   ;;  %v255_v1 = vld [vmem:[%s2464_s1 + $0xe0] sm:$0xff] }
  0x63   :  { %864 = vperm.xlu1 %1688, %v249_v35   ;;  %824 = vperm.xlu2 %1689, %v241_v15  }
  0x68   :  { %874 = vperm.xlu0 %1687, %v251_v4  }
  0x6b   :  { %879 = vperm.xlu1 %1688, %v252_v50   ;;  %839 = vperm.xlu2 %1689, %v244_v27  }
  0x6c   :  { %449 = vmatmul.bf16.gmra.mxu0 %v1959_v9  ;;  %489 = vmatmul.bf16.gmra.mxu2 %v1963_v11 }
  0x6d   :  { %538 = vmatmul.bf16.gmra.mxu1 %v1961_v10  ;;  %578 = vmatmul.bf16.gmra.mxu3 %v1965_v12 }
  0x70   :  { %889 = vperm.xlu0 %1687, %v254_v46   ;;  %v247_v46 = vld [vmem:[%s2464_s1 + $0xa0] sm:$0xff] }
  0x73   :  { %894 = vperm.xlu1 %1688, %v255_v1   ;;  %854 = vperm.xlu2 %1689, %v247_v46  }
  0x78   :  { %904 = vperm.xlu0 %1687, %v257_v61  }
  0x7b   :  { %909 = vperm.xlu1 %1688, %v258_v20   ;;  %v253_v20 = vld [vmem:[%s2464_s1 + $0xd0] sm:$0xff] }
  0x7c   :  { %454 = vmatmul.bf16.gmra.mxu0 %v1983_v51  ;;  %494 = vmatmul.bf16.gmra.mxu2 %v1987_v53 }
  0x7d   :  { %543 = vmatmul.bf16.gmra.mxu1 %v1985_v52  ;;  %583 = vmatmul.bf16.gmra.mxu3 %v1989_v54 }
  0x8c   :  { %459 = vmatmul.bf16.gmra.mxu0 %v2035_v40  ;;  %499 = vmatmul.bf16.gmra.mxu2 %v2039_v47 }
  0x8d   :  { %548 = vmatmul.bf16.gmra.mxu1 %v2037_v41  ;;  %588 = vmatmul.bf16.gmra.mxu3 %v2041_v49 }
  0x9c   :  { %464 = vmatmul.bf16.gmra.mxu0 %v2070_v30  ;;  %504 = vmatmul.bf16.gmra.mxu2 %v2074_v32 }
  0x9d   :  { %553 = vmatmul.bf16.gmra.mxu1 %v2072_v31  ;;  %593 = vmatmul.bf16.gmra.mxu3 %v2076_v33 }
  0xa9   :  { %v430_v62 = vpop.f32.mrf.mxu0 }
  0xaa   :  { %v519_v63 = vpop.f32.mrf.mxu1 }
  0xab   :  { %v520_v8 = vadd.f32 %v519_v63, %v430_v62 }
  0xaf   :  { %v470_v2 = vpop.f32.mrf.mxu2 }
  0xb0   :  { %v559_v5 = vpop.f32.mrf.mxu3 }
  0xb1   :  { %v432_v6 = vpop.f32.mrf.mxu0  ;;  %v2112_v21 = vadd.f32 %v559_v5, %v470_v2  ;;  %v250_v2 = vld [vmem:[%s2464_s1 + $0xb8] sm:$0xff] }
  0xb2   :  { %v521_v7 = vpop.f32.mrf.mxu1  ;;  %869 = vperm.xlu2 %1689, %v250_v2  }
  0xb3   :  { %v522_v13 = vadd.f32 %v521_v7, %v432_v6 }
  0xb5   :  { %v599_v14 = vpack.c.bf16 %v522_v13, %v520_v8 }
  0xb7   :  { %671 = vmatmul.bf16.vlgmr.msrb.gmra.mxu2 %v599_v14  ;;  %v472_v22 = vpop.f32.mrf.mxu2 }
  0xb8   :  { %v561_v23 = vpop.f32.mrf.mxu3 }
  0xb9   :  { %v435_v24 = vpop.f32.mrf.mxu0  ;;  %v2114_v55 = vadd.f32 %v561_v23, %v472_v22 }
  0xba   :  { %v524_v25 = vpop.f32.mrf.mxu1  ;;  %884 = vperm.xlu2 %1689, %v253_v20  }
  0xbb   :  { %v525_v4 = vadd.f32 %v524_v25, %v435_v24 }
  0xbf   :  { %v475_v28 = vpop.f32.mrf.mxu2 }
  0xc0   :  { %v564_v60 = vpop.f32.mrf.mxu3 }
  0xc1   :  { %v437_v29 = vpop.f32.mrf.mxu0  ;;  %v2124_v48 = vadd.f32 %v564_v60, %v475_v28  ;;  %v1627_v60 = vld [vmem:[#allocation2 + $0x64] sm:$0xf] }
  0xc2   :  { %v526_v3 = vpop.f32.mrf.mxu1 }
  0xc3   :  { %v527_v34 = vadd.f32 %v526_v3, %v437_v29  ;;  %v256_v29 = vld [vmem:[%s2464_s1 + $0xe8] sm:$0xff]  ;;  %s1775_s1 = smov [#allocation7]  }
  0xc4   :  { %899 = vperm.xlu2 %1689, %v256_v29   ;;  %s1489_s25 = sshll.u32 %s1775_s1, 4  ;;  %s1490_s25 = int_to_ptr.vmem [resolvable:$true] %s1489_s25 }
  0xc5   :  { %v600_v35 = vpack.c.bf16 %v527_v34, %v525_v4 }
  0xc7   :  { %676 = vmatmul.bf16.gmra.mxu2 %v600_v35  ;;  %v477_v50 = vpop.f32.mrf.mxu2 }
  0xc8   :  { %v566_v61 = vpop.f32.mrf.mxu3 }
  0xc9   :  { %v440_v62 = vpop.f32.mrf.mxu0  ;;  %v2126_v0 = vadd.f32 %v566_v61, %v477_v50 }
  0xca   :  { %v529_v63 = vpop.f32.mrf.mxu1 }
  0xcb   :  { %v530_v13 = vadd.f32 %v529_v63, %v440_v62 }
  0xcf   :  { %v480_v5 = vpop.f32.mrf.mxu2 }
  0xd0   :  { %v569_v6 = vpop.f32.mrf.mxu3 }
  0xd1   :  { %v442_v7 = vpop.f32.mrf.mxu0  ;;  %v2136_v22 = vadd.f32 %v569_v6, %v480_v5 }
  0xd2   :  { %v531_v8 = vpop.f32.mrf.mxu1 }
  0xd3   :  { %v532_v14 = vadd.f32 %v531_v8, %v442_v7 }
  0xd5   :  { %v601_v15 = vpack.c.bf16 %v532_v14, %v530_v13 }
  0xd7   :  { %681 = vmatmul.bf16.gmra.mxu2 %v601_v15  ;;  %v482_v23 = vpop.f32.mrf.mxu2 }
  0xd8   :  { %v571_v24 = vpop.f32.mrf.mxu3 }
  0xd9   :  { %v445_v25 = vpop.f32.mrf.mxu0  ;;  %v2138_v28 = vadd.f32 %v571_v24, %v482_v23 }
  0xda   :  { %v534_v27 = vpop.f32.mrf.mxu1 }
  0xdb   :  { %v535_v46 = vadd.f32 %v534_v27, %v445_v25 }
  0xdf   :  { %v485_v3 = vpop.f32.mrf.mxu2 }
  0xe0   :  { %v574_v4 = vpop.f32.mrf.mxu3 }
  0xe1   :  { %v447_v34 = vpop.f32.mrf.mxu0  ;;  %v2145_v62 = vadd.f32 %v574_v4, %v485_v3 }
  0xe2   :  { %v536_v35 = vpop.f32.mrf.mxu1 }
  0xe3   :  { %v537_v50 = vadd.f32 %v536_v35, %v447_v34 }
  0xe5   :  { %v602_v61 = vpack.c.bf16 %v537_v50, %v535_v46  ;;  %v1615_v46 = vld [vmem:[#allocation2 + $0x34] sm:$0xf] }
  0xe7   :  { %686 = vmatmul.bf16.gmra.mxu2 %v602_v61  ;;  %v487_v63 = vpop.f32.mrf.mxu2 }
  0xe8   :  { %v576_v2 = vpop.f32.mrf.mxu3 }
  0xe9   :  { %v450_v5 = vpop.f32.mrf.mxu0  ;;  %v2147_v7 = vadd.f32 %v576_v2, %v487_v63 }
  0xea   :  { %v539_v6 = vpop.f32.mrf.mxu1 }
  0xeb   :  { %v540_v23 = vadd.f32 %v539_v6, %v450_v5 }
  0xef   :  { %v490_v13 = vpop.f32.mrf.mxu2 }
  0xf0   :  { %v579_v14 = vpop.f32.mrf.mxu3 }
  0xf1   :  { %v452_v15 = vpop.f32.mrf.mxu0  ;;  %v2151_v27 = vadd.f32 %v579_v14, %v490_v13 }
  0xf2   :  { %v541_v20 = vpop.f32.mrf.mxu1 }
  0xf3   :  { %v542_v24 = vadd.f32 %v541_v20, %v452_v15  ;;  %v1631_v20 = vld [vmem:[#allocation2 + $0x74] sm:$0xf] }
  0xf5   :  { %v603_v25 = vpack.c.bf16 %v542_v24, %v540_v23  ;;  %v1648_v23 = vld [vmem:[#allocation2 + $0x78] sm:$0xf0] }
  0xf7   :  { %691 = vmatmul.bf16.gmra.mxu2 %v603_v25  ;;  %v492_v29 = vpop.f32.mrf.mxu2 }
  0xf8   :  { %v581_v3 = vpop.f32.mrf.mxu3 }
  0xf9   :  { %v455_v4 = vpop.f32.mrf.mxu0  ;;  %v2153_v35 = vadd.f32 %v581_v3, %v492_v29  ;;  %v1632_v3 = vor.u32 %v1648_v23, %v1631_v20  ;;  %v1645_v20 = vld [vmem:[#allocation2 + $0x48] sm:$0xf0] }
  0xfa   :  { %v544_v34 = vpop.f32.mrf.mxu1 }
  0xfb   :  { %v545_v8 = vadd.f32 %v544_v34, %v455_v4  ;;  %1073 = vmatpush.bf16.msrb.mxu3 %v1632_v3  ;;  %v1647_v4 = vld [vmem:[#allocation2 + $0x68] sm:$0xf0] }
  0xfc   :  { %v1628_v34 = vor.u32 %v1647_v4, %v1627_v60 }
  0xff   :  { %v495_v50 = vpop.f32.mrf.mxu2  ;;  %1074 = vmatpush.bf16.msrb.mxu3 %v1628_v34  ;;  %v1644_v34 = vld [vmem:[#allocation2 + $0x38] sm:$0xf0] }
 0x100   :  { %v584_v61 = vpop.f32.mrf.mxu3  ;;  %v1616_v49 = vor.u32 %v1644_v34, %v1615_v46  ;;  %v1603_v46 = vld [vmem:[#allocation2 + $0x4] sm:$0xf] }
 0x101   :  { %v457_v63 = vpop.f32.mrf.mxu0  ;;  %v2157_v15 = vadd.f32 %v584_v61, %v495_v50 }
 0x102   :  { %v546_v2 = vpop.f32.mrf.mxu1 }
 0x103   :  { %v547_v5 = vadd.f32 %v546_v2, %v457_v63  ;;  %v1646_v63 = vld [vmem:[#allocation2 + $0x58] sm:$0xf0] }
 0x105   :  { %v604_v6 = vpack.c.bf16 %v547_v5, %v545_v8  ;;  %v1623_v8 = vld [vmem:[#allocation2 + $0x54] sm:$0xf] }
 0x106   :  { %v1624_v50 = vor.u32 %v1646_v63, %v1623_v8 }
 0x107   :  { %696 = vmatmul.bf16.gmra.mxu2 %v604_v6  ;;  %v497_v13 = vpop.f32.mrf.mxu2 }
 0x108   :  { %v586_v14 = vpop.f32.mrf.mxu3  ;;  %1075 = vmatpush.bf16.msrb.mxu3 %v1624_v50 }
 0x109   :  { %v460_v24 = vpop.f32.mrf.mxu0  ;;  %v2159_v29 = vadd.f32 %v586_v14, %v497_v13  ;;  %v1619_v14 = vld [vmem:[#allocation2 + $0x44] sm:$0xf] }
 0x10a   :  { %v549_v25 = vpop.f32.mrf.mxu1  ;;  %v1620_v23 = vor.u32 %v1645_v20, %v1619_v14 }
 0x10b   :  { %v550_v1 = vadd.f32 %v549_v25, %v460_v24 }
 0x10c   :  { %1076 = vmatpush.bf16.msrb.mxu3 %v1620_v23 }
 0x10f   :  { %v500_v61 = vpop.f32.mrf.mxu2 }
 0x110   :  { %v589_v2 = vpop.f32.mrf.mxu3  ;;  %1077 = vmatpush.bf16.msrb.mxu3 %v1616_v49 }
 0x111   :  { %v462_v5 = vpop.f32.mrf.mxu0  ;;  %v2163_v3 = vadd.f32 %v589_v2, %v500_v61  ;;  %v1607_v2 = vld [vmem:[#allocation2 + $0x14] sm:$0xf] }
 0x112   :  { %v551_v6 = vpop.f32.mrf.mxu1 }
 0x113   :  { %v552_v26 = vadd.f32 %v551_v6, %v462_v5  ;;  %v1642_v5 = vld [vmem:[#allocation2 + $0x18] sm:$0xf0] }
 0x114   :  { %v1608_v14 = vor.u32 %v1642_v5, %v1607_v2 }
 0x115   :  { %v605_v13 = vpack.c.bf16 %v552_v26, %v550_v1  ;;  %v1611_v26 = vld [vmem:[#allocation2 + $0x24] sm:$0xf]  ;;  %v1643_v1 = vld [vmem:[#allocation2 + $0x28] sm:$0xf0] }
 0x116   :  { %v1612_v25 = vor.u32 %v1643_v1, %v1611_v26 }
 0x117   :  { %701 = vmatmul.bf16.gmra.mxu2 %v605_v13  ;;  %v502_v60 = vpop.f32.mrf.mxu2 }
 0x118   :  { %v591_v4 = vpop.f32.mrf.mxu3  ;;  %1078 = vmatpush.bf16.msrb.mxu3 %v1612_v25 }
 0x119   :  { %v465_v8 = vpop.f32.mrf.mxu0  ;;  %v2165_v33 = vadd.f32 %v591_v4, %v502_v60  ;;  %v1641_v4 = vld [vmem:[#allocation2 + $0x8] sm:$0xf0] }
 0x11a   :  { %v554_v63 = vpop.f32.mrf.mxu1  ;;  %v1604_v34 = vor.u32 %v1641_v4, %v1603_v46 }
 0x11b   :  { %v555_v20 = vadd.f32 %v554_v63, %v465_v8  ;;  %v2503_v8 = vpack.c.bf16 %v2114_v55, %v2112_v21  ;;  %v2178_v63 = vpop.permute.xlu0 %754  ;;  %v2504_v21 = vpack.c.bf16 %v2126_v0, %v2124_v48  ;;  %v2191_v55 = vpop.permute.xlu1 %764  ;;  %v2505_v48 = vpack.c.bf16 %v2138_v28, %v2136_v22 }
 0x11c   :  { %1079 = vmatpush.bf16.msrb.mxu3 %v1608_v14  ;;  %v2506_v22 = vpack.c.bf16 %v2147_v7, %v2145_v62  ;;  %v2508_v62 = vpack.c.bf16 %v2153_v35, %v2151_v27  ;;  %v2511_v35 = vpack.c.bf16 %v2159_v29, %v2157_v15  ;;  %v2514_v15 = vpack.c.bf16 %v2165_v33, %v2163_v3 }
 0x11f   :  { %v505_v50 = vpop.f32.mrf.mxu2 }
 0x120   :  { %v594_v61 = vpop.f32.mrf.mxu3  ;;  %1080 = vmatpush.bf16.msrb.mxu3 %v1604_v34 }
 0x121   :  { %v467_v6 = vpop.f32.mrf.mxu0  ;;  %v2169_v49 = vadd.f32 %v594_v61, %v505_v50 }
 0x122   :  { %v556_v13 = vpop.f32.mrf.mxu1 }
 0x123   :  { %v557_v23 = vadd.f32 %v556_v13, %v467_v6  ;;  %v2181_v6 = vld [vmem:[#allocation5] ss:$0 sm:$0xff]  ;;  %v2183_v50 = vpop.permute.xlu0 %759 }
 0x125   :  { %v606_v60 = vpack.c.bf16 %v557_v23, %v555_v20 }
 0x127   :  { %706 = vmatmul.bf16.gmra.mxu2 %v606_v60  ;;  %v507_v26 = vpop.f32.mrf.mxu2 }
 0x128   :  { %v596_v1 = vpop.f32.mrf.mxu3 }
 0x129   :  { %v2171_v25 = vadd.f32 %v596_v1, %v507_v26  ;;  %v2194_v26 = vpop.permute.xlu1 %769 }
 0x12b   :  { %v614_v24 = vpack.c.bf16 %v2171_v25, %v2169_v49 }
 0x137   :  { %711 = vmatmul.bf16.gmra.mxu2 %v2503_v8 }
 0x13a   :  { %v672_v2 = vpop.f32.mrf.mxu2 }
 0x13b   :  { %v912_v5 = vmul.f32 %v2178_v63, %v672_v2 }
 0x13d   :  { %v945_v13 = vadd.f32 %v2181_v6, %v912_v5 }
 0x13f   :  { %v977_v23 = vmax.f32 %v945_v13, 0.0  ;;  %v2202_v13 = vpop.permute.xlu2 %774 }
 0x142   :  { %v674_v61 = vpop.f32.mrf.mxu2 }
 0x143   :  { %v913_v14 = vmul.f32 %v2183_v50, %v674_v61 }
 0x145   :  { %v946_v20 = vadd.f32 %v2181_v6, %v913_v14 }
 0x147   :  { %v978_v60 = vmax.f32 %v946_v20, 0.0  ;;  %716 = vmatmul.bf16.gmra.mxu2 %v2504_v21 }
 0x149   :  { %v1009_v46 = vpack.c.bf16 %v978_v60, %v977_v23  ;;  %v2205_v60 = vpop.permute.xlu2 %779 }
 0x14a   :  { %v677_v4 = vpop.f32.mrf.mxu2 }
 0x14b   :  { %1081 = vmatmul.bf16.vlgmr.msrb.gmra.mxu3 %v1009_v46  ;;  %v914_v34 = vmul.f32 %v2191_v55, %v677_v4 }
 0x14d   :  { %v947_v8 = vadd.f32 %v2181_v6, %v914_v34 }
 0x14f   :  { %v979_v61 = vmax.f32 %v947_v8, 0.0 }
 0x152   :  { %v679_v1 = vpop.f32.mrf.mxu2 }
 0x153   :  { %v915_v2 = vmul.f32 %v2194_v26, %v679_v1 }
 0x155   :  { %v948_v5 = vadd.f32 %v2181_v6, %v915_v2 }
 0x157   :  { %721 = vmatmul.bf16.gmra.mxu2 %v2505_v48  ;;  %v980_v0 = vmax.f32 %v948_v5, 0.0  ;;  %v2213_v5 = vpop.permute.xlu0 %784  ;;  %v2216_v48 = vpop.permute.xlu1 %789 }
 0x158   :  { %2507 = vst [vmem:[#allocation16_spill] sm:$0xff] %v2216_v48 }
 0x159   :  { %v1010_v14 = vpack.c.bf16 %v980_v0, %v979_v61 }
 0x15a   :  { %v682_v20 = vpop.f32.mrf.mxu2 }
 0x15b   :  { %1086 = vmatmul.bf16.gmra.mxu3 %v1010_v14  ;;  %v916_v23 = vmul.f32 %v2202_v13, %v682_v20 }
 0x15d   :  { %v949_v46 = vadd.f32 %v2181_v6, %v916_v23 }
 0x15f   :  { %v981_v1 = vmax.f32 %v949_v46, 0.0 }
 0x162   :  { %v684_v21 = vpop.f32.mrf.mxu2 }
 0x163   :  { %v917_v4 = vmul.f32 %v2205_v60, %v684_v21 }
 0x165   :  { %v950_v34 = vadd.f32 %v2181_v6, %v917_v4 }
 0x167   :  { %726 = vmatmul.bf16.gmra.mxu2 %v2506_v22  ;;  %v982_v28 = vmax.f32 %v950_v34, 0.0  ;;  %v2224_v34 = vpop.permute.xlu2 %794  ;;  %v2227_v22 = vpop.permute.xlu0 %799 }
 0x168   :  { %2509 = vst [vmem:[#allocation17_spill] sm:$0xff] %v2224_v34 }
 0x169   :  { %v1011_v8 = vpack.c.bf16 %v982_v28, %v981_v1  ;;  %2510 = vst [vmem:[#allocation18_spill] sm:$0xff] %v2227_v22 }
 0x16a   :  { %v687_v2 = vpop.f32.mrf.mxu2 }
 0x16b   :  { %1091 = vmatmul.bf16.gmra.mxu3 %v1011_v8  ;;  %v918_v61 = vmul.f32 %v2213_v5, %v687_v2 }
 0x16d   :  { %v951_v14 = vadd.f32 %v2181_v6, %v918_v61 }
 0x16f   :  { %v983_v21 = vmax.f32 %v951_v14, 0.0 }
 0x172   :  { %v689_v0 = vpop.f32.mrf.mxu2 }
 0x173   :  { %v919_v20 = vmul.f32 %v2216_v48, %v689_v0 }
 0x175   :  { %v952_v23 = vadd.f32 %v2181_v6, %v919_v20 }
 0x177   :  { %731 = vmatmul.bf16.gmra.mxu2 %v2508_v62  ;;  %v984_v7 = vmax.f32 %v952_v23, 0.0  ;;  %v2235_v23 = vpop.permute.xlu1 %804  ;;  %v2238_v62 = vpop.permute.xlu2 %809 }
 0x178   :  { %2512 = vst [vmem:[#allocation19_spill] sm:$0xff] %v2235_v23 }
 0x179   :  { %v1012_v46 = vpack.c.bf16 %v984_v7, %v983_v21  ;;  %2513 = vst [vmem:[#allocation20_spill] sm:$0xff] %v2238_v62 }
 0x17a   :  { %v692_v4 = vpop.f32.mrf.mxu2 }
 0x17b   :  { %1096 = vmatmul.bf16.gmra.mxu3 %v1012_v46  ;;  %v920_v1 = vmul.f32 %v2224_v34, %v692_v4 }
 0x17d   :  { %v953_v8 = vadd.f32 %v2181_v6, %v920_v1 }
 0x17f   :  { %v985_v0 = vmax.f32 %v953_v8, 0.0 }
 0x182   :  { %v694_v28 = vpop.f32.mrf.mxu2 }
 0x183   :  { %v921_v2 = vmul.f32 %v2227_v22, %v694_v28 }
 0x185   :  { %v954_v61 = vadd.f32 %v2181_v6, %v921_v2 }
 0x187   :  { %v986_v27 = vmax.f32 %v954_v61, 0.0  ;;  %736 = vmatmul.bf16.gmra.mxu2 %v2511_v35  ;;  %v2246_v61 = vpop.permute.xlu0 %814 }
 0x188   :  { %2515 = vst [vmem:[#allocation21_spill] sm:$0xff] %v2246_v61 }
 0x189   :  { %v1013_v14 = vpack.c.bf16 %v986_v27, %v985_v0  ;;  %v2249_v27 = vpop.permute.xlu1 %819 }
 0x18a   :  { %v697_v20 = vpop.f32.mrf.mxu2  ;;  %2516 = vst [vmem:[#allocation22_spill] sm:$0xff] %v2249_v27 }
 0x18b   :  { %1101 = vmatmul.bf16.gmra.mxu3 %v1013_v14  ;;  %v922_v21 = vmul.f32 %v2235_v23, %v697_v20 }
 0x18d   :  { %v955_v46 = vadd.f32 %v2181_v6, %v922_v21 }
 0x18f   :  { %v987_v28 = vmax.f32 %v955_v46, 0.0 }
 0x191   :  { %v2265_v25 = vpop.permute.xlu1 %834 }
 0x192   :  { %v699_v7 = vpop.f32.mrf.mxu2  ;;  %2519 = vst [vmem:[#allocation25_spill] sm:$0xff] %v2265_v25 }
 0x193   :  { %v923_v4 = vmul.f32 %v2238_v62, %v699_v7 }
 0x195   :  { %v956_v1 = vadd.f32 %v2181_v6, %v923_v4  ;;  %v2257_v4 = vpop.permute.xlu2 %824 }
 0x196   :  { %2517 = vst [vmem:[#allocation23_spill] sm:$0xff] %v2257_v4 }
 0x197   :  { %v988_v8 = vmax.f32 %v956_v1, 0.0  ;;  %741 = vmatmul.bf16.gmra.mxu2 %v2514_v15 }
 0x199   :  { %v1014_v29 = vpack.c.bf16 %v988_v8, %v987_v28  ;;  %v2260_v28 = vpop.permute.xlu0 %829 }
 0x19a   :  { %v702_v2 = vpop.f32.mrf.mxu2  ;;  %2518 = vst [vmem:[#allocation24_spill] sm:$0xff] %v2260_v28 }
 0x19b   :  { %1106 = vmatmul.bf16.gmra.mxu3 %v1014_v29  ;;  %v924_v0 = vmul.f32 %v2246_v61, %v702_v2 }
 0x19d   :  { %v957_v14 = vadd.f32 %v2181_v6, %v924_v0 }
 0x19f   :  { %v989_v7 = vmax.f32 %v957_v14, 0.0 }
 0x1a2   :  { %v704_v35 = vpop.f32.mrf.mxu2 }
 0x1a3   :  { %v925_v20 = vmul.f32 %v2249_v27, %v704_v35 }
 0x1a5   :  { %v958_v21 = vadd.f32 %v2181_v6, %v925_v20  ;;  %v2268_v20 = vpop.permute.xlu2 %839 }
 0x1a6   :  { %2520 = vst [vmem:[#allocation26_spill] sm:$0xff] %v2268_v20 }
 0x1a7   :  { %v990_v46 = vmax.f32 %v958_v21, 0.0  ;;  %746 = vmatmul.bf16.gmra.mxu2 %v614_v24 }
 0x1a9   :  { %v1015_v33 = vpack.c.bf16 %v990_v46, %v989_v7 }
 0x1aa   :  { %v707_v3 = vpop.f32.mrf.mxu2 }
 0x1ab   :  { %1111 = vmatmul.bf16.gmra.mxu3 %v1015_v33  ;;  %v926_v1 = vmul.f32 %v2257_v4, %v707_v3 }
 0x1ad   :  { %v959_v15 = vadd.f32 %v2181_v6, %v926_v1 }
 0x1af   :  { %v991_v0 = vmax.f32 %v959_v15, 0.0 }
 0x1b2   :  { %v709_v8 = vpop.f32.mrf.mxu2 }
 0x1b3   :  { %v927_v29 = vmul.f32 %v2260_v28, %v709_v8 }
 0x1b5   :  { %v960_v2 = vadd.f32 %v2181_v6, %v927_v29  ;;  %v2273_v29 = vpop.permute.xlu0 %844 }
 0x1b6   :  { %2521 = vst [vmem:[#allocation27_spill] sm:$0xff] %v2273_v29 }
 0x1b7   :  { %v992_v35 = vmax.f32 %v960_v2, 0.0 }
 0x1b9   :  { %v1016_v49 = vpack.c.bf16 %v992_v35, %v991_v0  ;;  %v2278_v35 = vpop.permute.xlu1 %849 }
 0x1ba   :  { %v712_v24 = vpop.f32.mrf.mxu2  ;;  %2522 = vst [vmem:[#allocation28_spill] sm:$0xff] %v2278_v35 }
 0x1bb   :  { %1116 = vmatmul.bf16.gmra.mxu3 %v1016_v49  ;;  %v928_v14 = vmul.f32 %v2265_v25, %v712_v24 }
 0x1bd   :  { %v961_v7 = vadd.f32 %v2181_v6, %v928_v14 }
 0x1bf   :  { %v993_v3 = vmax.f32 %v961_v7, 0.0 }
 0x1c2   :  { %v714_v21 = vpop.f32.mrf.mxu2 }
 0x1c3   :  { %v929_v46 = vmul.f32 %v2268_v20, %v714_v21  ;;  %v2292_v20 = vpop.permute.xlu0 %859 }
 0x1c4   :  { %2524 = vst [vmem:[#allocation30_spill] sm:$0xff] %v2292_v20 }
 0x1c5   :  { %v962_v33 = vadd.f32 %v2181_v6, %v929_v46 }
 0x1c7   :  { %v994_v1 = vmax.f32 %v962_v33, 0.0 }
 0x1c9   :  { %v1017_v8 = vpack.c.bf16 %v994_v1, %v993_v3 }
 0x1ca   :  { %v717_v15 = vpop.f32.mrf.mxu2 }
 0x1cb   :  { %1121 = vmatmul.bf16.gmra.mxu3 %v1017_v8  ;;  %v930_v0 = vmul.f32 %v2273_v29, %v717_v15  ;;  %v2287_v15 = vpop.permute.xlu2 %854 }
 0x1cc   :  { %2523 = vst [vmem:[#allocation29_spill] sm:$0xff] %v2287_v15 }
 0x1cd   :  { %v963_v24 = vadd.f32 %v2181_v6, %v930_v0 }
 0x1ce   :  { %v2275_v2 = vpop.f32.mrf.mxu3 }
 0x1cf   :  { %v995_v46 = vmax.f32 %v963_v24, 0.0 }
 0x1d2   :  { %v719_v49 = vpop.f32.mrf.mxu2 }
 0x1d3   :  { %v931_v14 = vmul.f32 %v2278_v35, %v719_v49  ;;  %v2306_v28 = vpop.permute.xlu2 %869 }
 0x1d4   :  { %2526 = vst [vmem:[#allocation32_spill] sm:$0xff] %v2306_v28 }
 0x1d5   :  { %v964_v21 = vadd.f32 %v2181_v6, %v931_v14 }
 0x1d6   :  { %v2283_v7 = vpop.f32.mrf.mxu3 }
 0x1d7   :  { %v996_v33 = vmax.f32 %v964_v21, 0.0 }
 0x1d9   :  { %v1018_v1 = vpack.c.bf16 %v996_v33, %v995_v46 }
 0x1da   :  { %v722_v8 = vpop.f32.mrf.mxu2 }
 0x1db   :  { %1126 = vmatmul.bf16.gmra.mxu3 %v1018_v1  ;;  %v932_v0 = vmul.f32 %v2287_v15, %v722_v8  ;;  %v2301_v8 = vpop.permute.xlu1 %864  ;;  %v2326_v62 = vpop.permute.xlu2 %884 }
 0x1dc   :  { %2525 = vst [vmem:[#allocation31_spill] sm:$0xff] %v2301_v8 }
 0x1dd   :  { %v965_v14 = vadd.f32 %v2181_v6, %v932_v0  ;;  %2529 = vst [vmem:[#allocation35_spill] sm:$0xff] %v2326_v62 }
 0x1de   :  { %v2289_v29 = vpop.f32.mrf.mxu3 }
 0x1df   :  { %v997_v46 = vmax.f32 %v965_v14, 0.0 }
 0x1e2   :  { %v724_v49 = vpop.f32.mrf.mxu2 }
 0x1e3   :  { %v933_v24 = vmul.f32 %v2292_v20, %v724_v49  ;;  %v2320_v27 = vpop.permute.xlu1 %879 }
 0x1e4   :  { %2528 = vst [vmem:[#allocation34_spill] sm:$0xff] %v2320_v27 }
 0x1e5   :  { %v966_v21 = vadd.f32 %v2181_v6, %v933_v24 }
 0x1e6   :  { %v2297_v35 = vpop.f32.mrf.mxu3 }
 0x1e7   :  { %v998_v33 = vmax.f32 %v966_v21, 0.0 }
 0x1e9   :  { %v1019_v3 = vpack.c.bf16 %v998_v33, %v997_v46 }
 0x1ea   :  { %v727_v25 = vpop.f32.mrf.mxu2 }
 0x1eb   :  { %1131 = vmatmul.bf16.gmra.mxu3 %v1019_v3  ;;  %v934_v0 = vmul.f32 %v2301_v8, %v727_v25  ;;  %v2315_v25 = vpop.permute.xlu0 %874 }
 0x1ec   :  { %2527 = vst [vmem:[#allocation33_spill] sm:$0xff] %v2315_v25 }
 0x1ed   :  { %v967_v24 = vadd.f32 %v2181_v6, %v934_v0 }
 0x1ee   :  { %v2303_v15 = vpop.f32.mrf.mxu3 }
 0x1ef   :  { %v999_v46 = vmax.f32 %v967_v24, 0.0 }
 0x1f2   :  { %v729_v49 = vpop.f32.mrf.mxu2 }
 0x1f3   :  { %v935_v14 = vmul.f32 %v2306_v28, %v729_v49  ;;  %v2329_v54 = vpop.permute.xlu0 %889 }
 0x1f4   :  { %2530 = vst [vmem:[#allocation36_spill] sm:$0xff] %v2329_v54 }
 0x1f5   :  { %v968_v21 = vadd.f32 %v2181_v6, %v935_v14 }
 0x1f6   :  { %v2311_v20 = vpop.f32.mrf.mxu3 }
 0x1f7   :  { %v1000_v33 = vmax.f32 %v968_v21, 0.0 }
 0x1f9   :  { %v1020_v1 = vpack.c.bf16 %v1000_v33, %v999_v46 }
 0x1fa   :  { %v732_v4 = vpop.f32.mrf.mxu2 }
 0x1fb   :  { %1136 = vmatmul.bf16.gmra.mxu3 %v1020_v1  ;;  %v936_v0 = vmul.f32 %v2315_v25, %v732_v4 }
 0x1fd   :  { %v969_v14 = vadd.f32 %v2181_v6, %v936_v0 }
 0x1fe   :  { %v2317_v8 = vpop.f32.mrf.mxu3 }
 0x1ff   :  { %v1001_v3 = vmax.f32 %v969_v14, 0.0 }
 0x202   :  { %v734_v49 = vpop.f32.mrf.mxu2 }
 0x203   :  { %v937_v24 = vmul.f32 %v2320_v27, %v734_v49 }
 0x205   :  { %v970_v21 = vadd.f32 %v2181_v6, %v937_v24 }
 0x206   :  { %v1099_v28 = vpop.f32.mrf.mxu3 }
 0x207   :  { %v1002_v46 = vmax.f32 %v970_v21, 0.0  ;;  %v1165_v1 = vpack.c.bf16 %v1099_v28, %v2317_v8 }
 0x209   :  { %v1021_v33 = vpack.c.bf16 %v1002_v46, %v1001_v3  ;;  %v2334_v46 = vpop.permute.xlu1 %894 }
 0x20a   :  { %v737_v61 = vpop.f32.mrf.mxu2  ;;  %2531 = vst [vmem:[#allocation37_spill] sm:$0xff] %v2334_v46 }
 0x20b   :  { %1141 = vmatmul.bf16.gmra.mxu3 %v1021_v33  ;;  %v938_v25 = vmul.f32 %v2326_v62, %v737_v61  ;;  %v2337_v62 = vpop.permute.xlu2 %899 }
 0x20c   :  { %2532 = vst [vmem:[#allocation38_spill] sm:$0xff] %v2337_v62 }
 0x20d   :  { %v971_v49 = vadd.f32 %v2181_v6, %v938_v25 }
 0x20e   :  { %v1102_v4 = vpop.f32.mrf.mxu3 }
 0x20f   :  { %v1003_v27 = vmax.f32 %v971_v49, 0.0 }
 0x212   :  { %v739_v0 = vpop.f32.mrf.mxu2 }
 0x213   :  { %v939_v24 = vmul.f32 %v2329_v54, %v739_v0 }
 0x215   :  { %v972_v14 = vadd.f32 %v2181_v6, %v939_v24 }
 0x216   :  { %v1104_v21 = vpop.f32.mrf.mxu3 }
 0x217   :  { %v1004_v28 = vmax.f32 %v972_v14, 0.0  ;;  %v1166_v45 = vpack.c.bf16 %v1104_v21, %v1102_v4 }
 0x219   :  { %v1022_v8 = vpack.c.bf16 %v1004_v28, %v1003_v27 }
 0x21a   :  { %v742_v3 = vpop.f32.mrf.mxu2 }
 0x21b   :  { %1146 = vmatmul.bf16.gmra.mxu3 %v1022_v8  ;;  %v940_v61 = vmul.f32 %v2334_v46, %v742_v3  ;;  %v2342_v8 = vpop.permute.xlu0 %904  ;;  %v2345_v46 = vpop.permute.xlu1 %909 }
 0x21c   :  { %2533 = vst [vmem:[#allocation39_spill] sm:$0xff] %v2342_v8 }
 0x21d   :  { %v973_v25 = vadd.f32 %v2181_v6, %v940_v61 }
 0x21e   :  { %v1107_v33 = vpop.f32.mrf.mxu3 }
 0x21f   :  { %v1005_v49 = vmax.f32 %v973_v25, 0.0 }
 0x222   :  { %v744_v23 = vpop.f32.mrf.mxu2 }
 0x223   :  { %v941_v0 = vmul.f32 %v2337_v62, %v744_v23 }
 0x225   :  { %v974_v24 = vadd.f32 %v2181_v6, %v941_v0 }
 0x226   :  { %v1109_v54 = vpop.f32.mrf.mxu3 }
 0x227   :  { %v1006_v14 = vmax.f32 %v974_v24, 0.0 }
 0x229   :  { %v1023_v27 = vpack.c.bf16 %v1006_v14, %v1005_v49 }
 0x22a   :  { %v747_v28 = vpop.f32.mrf.mxu2 }
 0x22b   :  { %1151 = vmatmul.bf16.gmra.mxu3 %v1023_v27  ;;  %v942_v3 = vmul.f32 %v2342_v8, %v747_v28  ;;  %v1167_v8 = vpack.c.bf16 %v1109_v54, %v1107_v33 }
 0x22d   :  { %v975_v61 = vadd.f32 %v2181_v6, %v942_v3 }
 0x22e   :  { %v1112_v22 = vpop.f32.mrf.mxu3 }
 0x22f   :  { %v1007_v25 = vmax.f32 %v975_v61, 0.0 }
 0x232   :  { %v749_v12 = vpop.f32.mrf.mxu2 }
 0x233   :  { %v943_v23 = vmul.f32 %v2345_v46, %v749_v12 }
 0x235   :  { %v976_v0 = vadd.f32 %v2181_v6, %v943_v23  ;;  %v2534_v6 = vpack.c.bf16 %v2311_v20, %v2303_v15  ;;  %v2535_v23 = vpack.c.bf16 %v2297_v35, %v2289_v29 }
 0x236   :  { %v1114_v62 = vpop.f32.mrf.mxu3 }
 0x237   :  { %v1008_v24 = vmax.f32 %v976_v0, 0.0  ;;  %v1168_v48 = vpack.c.bf16 %v1114_v62, %v1112_v22 }
 0x239   :  { %v1024_v49 = vpack.c.bf16 %v1008_v24, %v1007_v25 }
 0x23b   :  { %1156 = vmatmul.bf16.gmra.mxu3 %v1024_v49 }
 0x23e   :  { %v1117_v14 = vpop.f32.mrf.mxu3 }
 0x246   :  { %v1119_v27 = vpop.f32.mrf.mxu3 }
 0x247   :  { %v1169_v34 = vpack.c.bf16 %v1119_v27, %v1117_v14 }
 0x249   :  { %1178 = vmatpush.bf16.msrb.mxu0 %v1169_v34 }
 0x24d   :  { %1179 = vmatpush.bf16.msrb.mxu0 %v1168_v48  ;;  %v2536_v48 = vpack.c.bf16 %v2283_v7, %v2275_v2 }
 0x24e   :  { %v1122_v28 = vpop.f32.mrf.mxu3 }
 0x251   :  { %1180 = vmatpush.bf16.msrb.mxu0 %v1167_v8 }
 0x255   :  { %1181 = vmatpush.bf16.msrb.mxu0 %v1166_v45 }
 0x256   :  { %v1124_v3 = vpop.f32.mrf.mxu3 }
 0x257   :  { %v1170_v12 = vpack.c.bf16 %v1124_v3, %v1122_v28 }
 0x259   :  { %1182 = vmatpush.bf16.msrb.mxu0 %v1165_v1 }
 0x25d   :  { %1183 = vmatpush.bf16.msrb.mxu0 %v2534_v6 }
 0x25e   :  { %v1127_v61 = vpop.f32.mrf.mxu3 }
 0x261   :  { %1184 = vmatpush.bf16.msrb.mxu0 %v2535_v23 }
 0x265   :  { %1185 = vmatpush.bf16.msrb.mxu0 %v2536_v48 }
 0x266   :  { %v1129_v54 = vpop.f32.mrf.mxu3 }
 0x267   :  { %v1171_v34 = vpack.c.bf16 %v1129_v54, %v1127_v61 }
 0x268   :  { %1186 = vmatmul.bf16.vlgmr.msrb.gmra.mxu0 %v1875_v36 }
 0x26e   :  { %v1132_v45 = vpop.f32.mrf.mxu3 }
 0x276   :  { %v1134_v22 = vpop.f32.mrf.mxu3 }
 0x277   :  { %v1172_v62 = vpack.c.bf16 %v1134_v22, %v1132_v45 }
 0x278   :  { %1191 = vmatmul.bf16.gmra.mxu0 %v1887_v56 }
 0x27e   :  { %v1137_v20 = vpop.f32.mrf.mxu3 }
 0x286   :  { %v1139_v15 = vpop.f32.mrf.mxu3 }
 0x287   :  { %v1173_v1 = vpack.c.bf16 %v1139_v15, %v1137_v20  ;;  %v2537_v15 = vld [vmem:[#allocation11_spill] sm:$0xff] }
 0x288   :  { %1196 = vmatmul.bf16.gmra.mxu0 %v1911_v16 }
 0x28e   :  { %v1142_v29 = vpop.f32.mrf.mxu3 }
 0x296   :  { %v1144_v35 = vpop.f32.mrf.mxu3 }
 0x297   :  { %v1174_v0 = vpack.c.bf16 %v1144_v35, %v1142_v29 }
 0x298   :  { %1201 = vmatmul.bf16.gmra.mxu0 %v1926_v42 }
 0x29e   :  { %v1147_v2 = vpop.f32.mrf.mxu3 }
 0x2a6   :  { %v1149_v7 = vpop.f32.mrf.mxu3 }
 0x2a7   :  { %v1175_v16 = vpack.c.bf16 %v1149_v7, %v1147_v2  ;;  %v2538_v7 = vld [vmem:[#allocation16_spill] sm:$0xff] }
 0x2a8   :  { %1206 = vmatmul.bf16.gmra.mxu0 %v1959_v9 }
 0x2ae   :  { %v1152_v4 = vpop.f32.mrf.mxu3 }
 0x2b6   :  { %v1154_v36 = vpop.f32.mrf.mxu3 }
 0x2b7   :  { %v1176_v8 = vpack.c.bf16 %v1154_v36, %v1152_v4 }
 0x2b8   :  { %1211 = vmatmul.bf16.gmra.mxu0 %v1983_v51 }
 0x2be   :  { %v1157_v21 = vpop.f32.mrf.mxu3 }
 0x2c6   :  { %v1159_v33 = vpop.f32.mrf.mxu3 }
 0x2c7   :  { %v1177_v56 = vpack.c.bf16 %v1159_v33, %v1157_v21 }
 0x2c8   :  { %1216 = vmatmul.bf16.gmra.mxu0 %v2035_v40 }
 0x2c9   :  { %1267 = vmatpush.bf16.msrb.mxu1 %v1177_v56  ;;  %v2539_v56 = vld [vmem:[#allocation17_spill] sm:$0xff] }
 0x2cd   :  { %1268 = vmatpush.bf16.msrb.mxu1 %v1176_v8 }
 0x2d1   :  { %1269 = vmatpush.bf16.msrb.mxu1 %v1175_v16 }
 0x2d5   :  { %1270 = vmatpush.bf16.msrb.mxu1 %v1174_v0 }
 0x2d8   :  { %1221 = vmatmul.bf16.gmra.mxu0 %v2070_v30 }
 0x2d9   :  { %1271 = vmatpush.bf16.msrb.mxu1 %v1173_v1 }
 0x2dd   :  { %1272 = vmatpush.bf16.msrb.mxu1 %v1172_v62 }
 0x2e1   :  { %1273 = vmatpush.bf16.msrb.mxu1 %v1171_v34 }
 0x2e5   :  { %1274 = vmatpush.bf16.msrb.mxu1 %v1170_v12  ;;  %v1187_v42 = vpop.f32.mrf.mxu0 }
 0x2e8   :  { %1275 = vmatmul.bf16.vlgmr.msrb.gmra.mxu1 %v1877_v37  ;;  %1226 = vmatmul.bf16.gmra.mxu0 %v1879_v38 }
 0x2ed   :  { %v1189_v37 = vpop.f32.mrf.mxu0 }
 0x2f5   :  { %v1192_v38 = vpop.f32.mrf.mxu0 }
 0x2f8   :  { %1280 = vmatmul.bf16.gmra.mxu1 %v1889_v57  ;;  %1231 = vmatmul.bf16.gmra.mxu0 %v1891_v58 }
 0x2fd   :  { %v1194_v57 = vpop.f32.mrf.mxu0 }
 0x305   :  { %v1197_v58 = vpop.f32.mrf.mxu0 }
 0x308   :  { %1285 = vmatmul.bf16.gmra.mxu1 %v1913_v17  ;;  %1236 = vmatmul.bf16.gmra.mxu0 %v1915_v18 }
 0x30d   :  { %v1199_v18 = vpop.f32.mrf.mxu0 }
 0x318   :  { %1290 = vmatmul.bf16.gmra.mxu1 %v1928_v43  ;;  %1241 = vmatmul.bf16.gmra.mxu0 %v1930_v44  ;;  %v2382_v44 = vld [vmem:[#allocation5 + $0x1] ss:$0 sm:$0xff] }
 0x328   :  { %1295 = vmatmul.bf16.gmra.mxu1 %v1961_v10  ;;  %1246 = vmatmul.bf16.gmra.mxu0 %v1963_v11 }
 0x338   :  { %1300 = vmatmul.bf16.gmra.mxu1 %v1985_v52  ;;  %1251 = vmatmul.bf16.gmra.mxu0 %v1987_v53  ;;  %v1202_v52 = vpop.f32.mrf.mxu0 }
 0x348   :  { %1305 = vmatmul.bf16.gmra.mxu1 %v2037_v41  ;;  %1256 = vmatmul.bf16.gmra.mxu0 %v2039_v47 }
 0x358   :  { %1310 = vmatmul.bf16.gmra.mxu1 %v2072_v31  ;;  %v1204_v31 = vpop.f32.mrf.mxu0  ;;  %1261 = vmatmul.bf16.gmra.mxu0 %v2074_v32 }
 0x360   :  { %v1207_v14 = vpop.f32.mrf.mxu0 }
 0x365   :  { %v1276_v17 = vpop.f32.mrf.mxu1 }
 0x366   :  { %v1277_v43 = vadd.f32 %v1276_v17, %v1187_v42 }
 0x368   :  { %v1356_v9 = vmul.f32 %v1277_v43, %v2178_v63  ;;  %1315 = vmatmul.bf16.gmra.mxu1 %v1881_v39  ;;  %v1209_v32 = vpop.f32.mrf.mxu0 }
 0x36a   :  { %v1389_v10 = vadd.f32 %v2382_v44, %v1356_v9 }
 0x36c   :  { %v1421_v11 = vmax.f32 %v1389_v10, 0.0 }
 0x36d   :  { %v1278_v51 = vpop.f32.mrf.mxu1 }
 0x36e   :  { %1453 = vst [vmem:[#allocation7] sm:$0xff] %v1421_v11  ;;  %v1279_v53 = vadd.f32 %v1278_v51, %v1189_v37  ;;  %v2542_v11 = vld [vmem:[#allocation19_spill] sm:$0xff] }
 0x370   :  { %v1357_v40 = vmul.f32 %v1279_v53, %v2183_v50  ;;  %v1212_v48 = vpop.f32.mrf.mxu0 }
 0x372   :  { %v1390_v41 = vadd.f32 %v2382_v44, %v1357_v40 }
 0x374   :  { %v1422_v30 = vmax.f32 %v1390_v41, 0.0 }
 0x375   :  { %v1281_v47 = vpop.f32.mrf.mxu1 }
 0x376   :  { %1454 = vst [vmem:[#allocation7 + $0x8] sm:$0xff] %v1422_v30  ;;  %v1282_v63 = vadd.f32 %v1281_v47, %v1192_v38 }
 0x378   :  { %v1358_v39 = vmul.f32 %v1282_v63, %v2191_v55  ;;  %1320 = vmatmul.bf16.gmra.mxu1 %v1893_v59  ;;  %v1214_v62 = vpop.f32.mrf.mxu0 }
 0x37a   :  { %v1391_v25 = vadd.f32 %v2382_v44, %v1358_v39 }
 0x37c   :  { %v1423_v24 = vmax.f32 %v1391_v25, 0.0 }
 0x37d   :  { %v1283_v49 = vpop.f32.mrf.mxu1 }
 0x37e   :  { %1455 = vst [vmem:[#allocation7 + $0x10] sm:$0xff] %v1423_v24  ;;  %v1284_v50 = vadd.f32 %v1283_v49, %v1194_v57  ;;  %v2541_v57 = vld [vmem:[#allocation18_spill] sm:$0xff] }
 0x380   :  { %v1359_v27 = vmul.f32 %v1284_v50, %v2194_v26  ;;  %v1217_v2 = vpop.f32.mrf.mxu0  ;;  %v2545_v50 = vld [vmem:[#allocation21_spill] sm:$0xff] }
 0x382   :  { %v1392_v28 = vadd.f32 %v2382_v44, %v1359_v27 }
 0x384   :  { %v1424_v3 = vmax.f32 %v1392_v28, 0.0  ;;  %v2546_v28 = vld [vmem:[#allocation14_spill] sm:$0xff] }
 0x385   :  { %v1286_v12 = vpop.f32.mrf.mxu1 }
 0x386   :  { %1456 = vst [vmem:[#allocation7 + $0x18] sm:$0xff] %v1424_v3  ;;  %v1287_v6 = vadd.f32 %v1286_v12, %v1197_v58 }
 0x388   :  { %v1360_v55 = vmul.f32 %v1287_v6, %v2202_v13  ;;  %1325 = vmatmul.bf16.gmra.mxu1 %v1917_v19  ;;  %v1219_v16 = vpop.f32.mrf.mxu0 }
 0x38a   :  { %v1393_v59 = vadd.f32 %v2382_v44, %v1360_v55  ;;  %v2547_v55 = vld [vmem:[#allocation22_spill] sm:$0xff] }
 0x38c   :  { %v1425_v61 = vmax.f32 %v1393_v59, 0.0 }
 0x38d   :  { %v1288_v23 = vpop.f32.mrf.mxu1 }
 0x38e   :  { %1457 = vst [vmem:[#allocation7 + $0x20] sm:$0xff] %v1425_v61  ;;  %v1289_v54 = vadd.f32 %v1288_v23, %v1199_v18 }
 0x390   :  { %v1361_v26 = vmul.f32 %v1289_v54, %v2205_v60  ;;  %v1222_v18 = vpop.f32.mrf.mxu0 }
 0x392   :  { %v1394_v34 = vadd.f32 %v2382_v44, %v1361_v26 }
 0x394   :  { %v1426_v45 = vmax.f32 %v1394_v34, 0.0  ;;  %v2548_v34 = vld [vmem:[#allocation23_spill] sm:$0xff] }
 0x395   :  { %v1291_v22 = vpop.f32.mrf.mxu1 }
 0x396   :  { %1458 = vst [vmem:[#allocation7 + $0x28] sm:$0xff] %v1426_v45  ;;  %v1292_v20 = vadd.f32 %v1291_v22, %v1202_v52  ;;  %v2543_v52 = vld [vmem:[#allocation13_spill] sm:$0xff]  ;;  %v2549_v22 = vld [vmem:[#allocation15_spill] sm:$0xff] }
 0x398   :  { %v1362_v13 = vmul.f32 %v1292_v20, %v2213_v5  ;;  %1330 = vmatmul.bf16.gmra.mxu1 %v2537_v15  ;;  %v2540_v5 = vld [vmem:[#allocation12_spill] sm:$0xff]  ;;  %v1224_v30 = vpop.f32.mrf.mxu0 }
 0x39a   :  { %v1395_v19 = vadd.f32 %v2382_v44, %v1362_v13 }
 0x39c   :  { %v1427_v1 = vmax.f32 %v1395_v19, 0.0 }
 0x39d   :  { %v1293_v29 = vpop.f32.mrf.mxu1 }
 0x39e   :  { %1459 = vst [vmem:[#allocation7 + $0x30] sm:$0xff] %v1427_v1  ;;  %v1294_v35 = vadd.f32 %v1293_v29, %v1204_v31  ;;  %v2544_v31 = vld [vmem:[#allocation20_spill] sm:$0xff] }
 0x39f   :  { %v2550_v1 = vld [vmem:[#allocation24_spill] sm:$0xff] }
 0x3a0   :  { %v1363_v60 = vmul.f32 %v1294_v35, %v2538_v7 }
 0x3a2   :  { %v1396_v4 = vadd.f32 %v2382_v44, %v1363_v60 }
 0x3a4   :  { %v1428_v36 = vmax.f32 %v1396_v4, 0.0 }
 0x3a5   :  { %v1296_v21 = vpop.f32.mrf.mxu1 }
 0x3a6   :  { %1460 = vst [vmem:[#allocation7 + $0x38] sm:$0xff] %v1428_v36  ;;  %v1297_v33 = vadd.f32 %v1296_v21, %v1207_v14  ;;  %v1227_v14 = vpop.f32.mrf.mxu0  ;;  %v2551_v36 = vld [vmem:[#allocation25_spill] sm:$0xff] }
 0x3a8   :  { %v1364_v8 = vmul.f32 %v1297_v33, %v2539_v56  ;;  %1335 = vmatmul.bf16.gmra.mxu1 %v2540_v5 }
 0x3aa   :  { %v1397_v0 = vadd.f32 %v2382_v44, %v1364_v8 }
 0x3ac   :  { %v1429_v42 = vmax.f32 %v1397_v0, 0.0  ;;  %v2552_v0 = vld [vmem:[#allocation26_spill] sm:$0xff] }
 0x3ad   :  { %v1298_v37 = vpop.f32.mrf.mxu1 }
 0x3ae   :  { %1461 = vst [vmem:[#allocation7 + $0x40] sm:$0xff] %v1429_v42  ;;  %v1299_v38 = vadd.f32 %v1298_v37, %v1209_v32  ;;  %v1229_v61 = vpop.f32.mrf.mxu0 }
 0x3b0   :  { %v1365_v58 = vmul.f32 %v1299_v38, %v2541_v57 }
 0x3b2   :  { %v1398_v17 = vadd.f32 %v2382_v44, %v1365_v58 }
 0x3b4   :  { %v1430_v43 = vmax.f32 %v1398_v17, 0.0  ;;  %v2553_v17 = vld [vmem:[#allocation27_spill] sm:$0xff] }
 0x3b5   :  { %v1301_v9 = vpop.f32.mrf.mxu1 }
 0x3b6   :  { %1462 = vst [vmem:[#allocation7 + $0x48] sm:$0xff] %v1430_v43  ;;  %v1302_v10 = vadd.f32 %v1301_v9, %v1212_v48  ;;  %v1232_v20 = vpop.f32.mrf.mxu0 }
 0x3b8   :  { %v1366_v51 = vmul.f32 %v1302_v10, %v2542_v11  ;;  %1340 = vmatmul.bf16.gmra.mxu1 %v2543_v52  ;;  %v2554_v52 = vld [vmem:[#allocation28_spill] sm:$0xff] }
 0x3ba   :  { %v1399_v53 = vadd.f32 %v2382_v44, %v1366_v51 }
 0x3bc   :  { %v1431_v40 = vmax.f32 %v1399_v53, 0.0 }
 0x3bd   :  { %v1303_v41 = vpop.f32.mrf.mxu1 }
 0x3be   :  { %1463 = vst [vmem:[#allocation7 + $0x50] sm:$0xff] %v1431_v40  ;;  %v1304_v47 = vadd.f32 %v1303_v41, %v1214_v62  ;;  %v1234_v60 = vpop.f32.mrf.mxu0 }
 0x3c0   :  { %v1367_v63 = vmul.f32 %v1304_v47, %v2544_v31 }
 0x3c2   :  { %v1400_v39 = vadd.f32 %v2382_v44, %v1367_v63  ;;  %v2555_v63 = vld [vmem:[#allocation29_spill] sm:$0xff] }
 0x3c4   :  { %v1432_v25 = vmax.f32 %v1400_v39, 0.0 }
 0x3c5   :  { %v1306_v24 = vpop.f32.mrf.mxu1 }
 0x3c6   :  { %1464 = vst [vmem:[#allocation7 + $0x58] sm:$0xff] %v1432_v25  ;;  %v1307_v49 = vadd.f32 %v1306_v24, %v1217_v2 }
 0x3c8   :  { %v1368_v27 = vmul.f32 %v1307_v49, %v2545_v50  ;;  %1345 = vmatmul.bf16.gmra.mxu1 %v2546_v28 }
 0x3ca   :  { %v1401_v3 = vadd.f32 %v2382_v44, %v1368_v27  ;;  %v2556_v27 = vld [vmem:[#allocation30_spill] sm:$0xff] }
 0x3cc   :  { %v1433_v12 = vmax.f32 %v1401_v3, 0.0 }
 0x3cd   :  { %v1308_v32 = vpop.f32.mrf.mxu1 }
 0x3ce   :  { %1465 = vst [vmem:[#allocation7 + $0x60] sm:$0xff] %v1433_v12  ;;  %v1309_v6 = vadd.f32 %v1308_v32, %v1219_v16  ;;  %v1237_v16 = vpop.f32.mrf.mxu0 }
 0x3d0   :  { %v1369_v59 = vmul.f32 %v1309_v6, %v2547_v55 }
 0x3d2   :  { %v1402_v23 = vadd.f32 %v2382_v44, %v1369_v59  ;;  %v2557_v59 = vld [vmem:[#allocation31_spill] sm:$0xff] }
 0x3d4   :  { %v1434_v48 = vmax.f32 %v1402_v23, 0.0 }
 0x3d5   :  { %v1311_v54 = vpop.f32.mrf.mxu1 }
 0x3d6   :  { %1466 = vst [vmem:[#allocation7 + $0x68] sm:$0xff] %v1434_v48  ;;  %v1312_v26 = vadd.f32 %v1311_v54, %v1222_v18  ;;  %v1239_v43 = vpop.f32.mrf.mxu0 }
 0x3d8   :  { %v1370_v45 = vmul.f32 %v1312_v26, %v2548_v34  ;;  %1350 = vmatmul.bf16.gmra.mxu1 %v2549_v22  ;;  %v2558_v34 = vld [vmem:[#allocation32_spill] sm:$0xff] }
 0x3da   :  { %v1403_v62 = vadd.f32 %v2382_v44, %v1370_v45 }
 0x3dc   :  { %v1435_v13 = vmax.f32 %v1403_v62, 0.0 }
 0x3dd   :  { %v1313_v15 = vpop.f32.mrf.mxu1 }
 0x3de   :  { %1467 = vst [vmem:[#allocation7 + $0x70] sm:$0xff] %v1435_v13  ;;  %v1314_v19 = vadd.f32 %v1313_v15, %v1224_v30  ;;  %v1242_v41 = vpop.f32.mrf.mxu0 }
 0x3e0   :  { %v1371_v29 = vmul.f32 %v1314_v19, %v2550_v1  ;;  %v2559_v19 = vld [vmem:[#allocation33_spill] sm:$0xff] }
 0x3e2   :  { %v1404_v35 = vadd.f32 %v2382_v44, %v1371_v29 }
 0x3e4   :  { %v1436_v2 = vmax.f32 %v1404_v35, 0.0 }
 0x3e5   :  { %v1316_v7 = vpop.f32.mrf.mxu1 }
 0x3e6   :  { %1468 = vst [vmem:[#allocation7 + $0x78] sm:$0xff] %v1436_v2  ;;  %v1317_v4 = vadd.f32 %v1316_v7, %v1227_v14  ;;  %v1244_v14 = vpop.f32.mrf.mxu0 }
 0x3e8   :  { %v1372_v21 = vmul.f32 %v1317_v4, %v2551_v36  ;;  %v2560_v4 = vld [vmem:[#allocation34_spill] sm:$0xff] }
 0x3ea   :  { %v1405_v33 = vadd.f32 %v2382_v44, %v1372_v21 }
 0x3ec   :  { %v1437_v56 = vmax.f32 %v1405_v33, 0.0 }
 0x3ed   :  { %v1318_v8 = vpop.f32.mrf.mxu1 }
 0x3ee   :  { %1469 = vst [vmem:[#allocation7 + $0x80] sm:$0xff] %v1437_v56  ;;  %v1319_v5 = vadd.f32 %v1318_v8, %v1229_v61  ;;  %v1247_v55 = vpop.f32.mrf.mxu0 }
 0x3f0   :  { %v1373_v42 = vmul.f32 %v1319_v5, %v2552_v0 }
 0x3f2   :  { %v1406_v37 = vadd.f32 %v2382_v44, %v1373_v42 }
 0x3f4   :  { %v1438_v38 = vmax.f32 %v1406_v37, 0.0 }
 0x3f5   :  { %v1321_v57 = vpop.f32.mrf.mxu1 }
 0x3f6   :  { %1470 = vst [vmem:[#allocation7 + $0x88] sm:$0xff] %v1438_v38  ;;  %v1322_v58 = vadd.f32 %v1321_v57, %v1232_v20  ;;  %v1249_v22 = vpop.f32.mrf.mxu0 }
 0x3f8   :  { %v1374_v18 = vmul.f32 %v1322_v58, %v2553_v17  ;;  %v2562_v17 = vld [vmem:[#allocation36_spill] sm:$0xff] }
 0x3fa   :  { %v1407_v9 = vadd.f32 %v2382_v44, %v1374_v18 }
 0x3fc   :  { %v1439_v10 = vmax.f32 %v1407_v9, 0.0 }
 0x3fd   :  { %v1323_v11 = vpop.f32.mrf.mxu1 }
 0x3fe   :  { %1471 = vst [vmem:[#allocation7 + $0x90] sm:$0xff] %v1439_v10  ;;  %v1324_v51 = vadd.f32 %v1323_v11, %v1234_v60  ;;  %v1252_v35 = vpop.f32.mrf.mxu0 }
 0x400   :  { %v1375_v53 = vmul.f32 %v1324_v51, %v2554_v52  ;;  %v2563_v51 = vld [vmem:[#allocation37_spill] sm:$0xff] }
 0x402   :  { %v1408_v40 = vadd.f32 %v2382_v44, %v1375_v53 }
 0x404   :  { %v1440_v30 = vmax.f32 %v1408_v40, 0.0 }
 0x405   :  { %v1326_v47 = vpop.f32.mrf.mxu1 }
 0x406   :  { %1472 = vst [vmem:[#allocation7 + $0x98] sm:$0xff] %v1440_v30  ;;  %v1327_v31 = vadd.f32 %v1326_v47, %v1237_v16  ;;  %v1254_v8 = vpop.f32.mrf.mxu0  ;;  %v2561_v16 = vld [vmem:[#allocation35_spill] sm:$0xff] }
 0x408   :  { %v1376_v39 = vmul.f32 %v1327_v31, %v2555_v63  ;;  %v2564_v31 = vld [vmem:[#allocation38_spill] sm:$0xff] }
 0x40a   :  { %v1409_v25 = vadd.f32 %v2382_v44, %v1376_v39 }
 0x40c   :  { %v1441_v24 = vmax.f32 %v1409_v25, 0.0 }
 0x40d   :  { %v1328_v49 = vpop.f32.mrf.mxu1 }
 0x40e   :  { %1473 = vst [vmem:[#allocation7 + $0xa0] sm:$0xff] %v1441_v24  ;;  %v1329_v50 = vadd.f32 %v1328_v49, %v1239_v43  ;;  %v1257_v58 = vpop.f32.mrf.mxu0 }
 0x410   :  { %v1377_v28 = vmul.f32 %v1329_v50, %v2556_v27  ;;  %v2565_v50 = vld [vmem:[#allocation39_spill] sm:$0xff] }
 0x412   :  { %v1410_v3 = vadd.f32 %v2382_v44, %v1377_v28 }
 0x414   :  { %v1442_v12 = vmax.f32 %v1410_v3, 0.0 }
 0x415   :  { %v1331_v32 = vpop.f32.mrf.mxu1 }
 0x416   :  { %1474 = vst [vmem:[#allocation7 + $0xa8] sm:$0xff] %v1442_v12  ;;  %v1332_v6 = vadd.f32 %v1331_v32, %v1242_v41  ;;  %v1259_v53 = vpop.f32.mrf.mxu0 }
 0x418   :  { %v1378_v61 = vmul.f32 %v1332_v6, %v2557_v59 }
 0x41a   :  { %v1411_v23 = vadd.f32 %v2382_v44, %v1378_v61 }
 0x41c   :  { %v1443_v48 = vmax.f32 %v1411_v23, 0.0 }
 0x41d   :  { %v1333_v54 = vpop.f32.mrf.mxu1 }
 0x41e   :  { %1475 = vst [vmem:[#allocation7 + $0xb0] sm:$0xff] %v1443_v48  ;;  %v1334_v26 = vadd.f32 %v1333_v54, %v1244_v14  ;;  %v1262_v25 = vpop.f32.mrf.mxu0 }
 0x420   :  { %v1379_v45 = vmul.f32 %v1334_v26, %v2558_v34 }
 0x422   :  { %v1412_v62 = vadd.f32 %v2382_v44, %v1379_v45 }
 0x424   :  { %v1444_v20 = vmax.f32 %v1412_v62, 0.0 }
 0x425   :  { %v1336_v13 = vpop.f32.mrf.mxu1 }
 0x426   :  { %1476 = vst [vmem:[#allocation7 + $0xb8] sm:$0xff] %v1444_v20  ;;  %v1337_v15 = vadd.f32 %v1336_v13, %v1247_v55  ;;  %v1264_v12 = vpop.f32.mrf.mxu0 }
 0x428   :  { %v1380_v1 = vmul.f32 %v1337_v15, %v2559_v19 }
 0x42a   :  { %v1413_v29 = vadd.f32 %v2382_v44, %v1380_v1 }
 0x42c   :  { %v1445_v2 = vmax.f32 %v1413_v29, 0.0 }
 0x42d   :  { %v1338_v7 = vpop.f32.mrf.mxu1 }
 0x42e   :  { %1477 = vst [vmem:[#allocation7 + $0xc0] sm:$0xff] %v1445_v2  ;;  %v1339_v60 = vadd.f32 %v1338_v7, %v1249_v22 }
 0x430   :  { %v1381_v36 = vmul.f32 %v1339_v60, %v2560_v4 }
 0x432   :  { %v1414_v21 = vadd.f32 %v2382_v44, %v1381_v36 }
 0x434   :  { %v1446_v33 = vmax.f32 %v1414_v21, 0.0 }
 0x435   :  { %v1341_v56 = vpop.f32.mrf.mxu1 }
 0x436   :  { %1478 = vst [vmem:[#allocation7 + $0xc8] sm:$0xff] %v1446_v33  ;;  %v1342_v5 = vadd.f32 %v1341_v56, %v1252_v35 }
 0x438   :  { %v1382_v0 = vmul.f32 %v1342_v5, %v2561_v16 }
 0x43a   :  { %v1415_v42 = vadd.f32 %v2382_v44, %v1382_v0 }
 0x43c   :  { %v1447_v37 = vmax.f32 %v1415_v42, 0.0 }
 0x43d   :  { %v1343_v38 = vpop.f32.mrf.mxu1 }
 0x43e   :  { %1479 = vst [vmem:[#allocation7 + $0xd0] sm:$0xff] %v1447_v37  ;;  %v1344_v57 = vadd.f32 %v1343_v38, %v1254_v8 }
 0x440   :  { %v1383_v18 = vmul.f32 %v1344_v57, %v2562_v17 }
 0x442   :  { %v1416_v43 = vadd.f32 %v2382_v44, %v1383_v18 }
 0x444   :  { %v1448_v9 = vmax.f32 %v1416_v43, 0.0 }
 0x445   :  { %v1346_v10 = vpop.f32.mrf.mxu1 }
 0x446   :  { %1480 = vst [vmem:[#allocation7 + $0xd8] sm:$0xff] %v1448_v9  ;;  %v1347_v11 = vadd.f32 %v1346_v10, %v1257_v58 }
 0x448   :  { %v1384_v52 = vmul.f32 %v1347_v11, %v2563_v51 }
 0x44a   :  { %v1417_v40 = vadd.f32 %v2382_v44, %v1384_v52 }
 0x44c   :  { %v1449_v41 = vmax.f32 %v1417_v40, 0.0 }
 0x44d   :  { %v1348_v30 = vpop.f32.mrf.mxu1 }
 0x44e   :  { %1481 = vst [vmem:[#allocation7 + $0xe0] sm:$0xff] %v1449_v41  ;;  %v1349_v47 = vadd.f32 %v1348_v30, %v1259_v53 }
 0x450   :  { %v1385_v63 = vmul.f32 %v1349_v47, %v2564_v31 }
 0x452   :  { %v1418_v39 = vadd.f32 %v2382_v44, %v1385_v63 }
 0x454   :  { %v1450_v24 = vmax.f32 %v1418_v39, 0.0 }
 0x455   :  { %v1351_v49 = vpop.f32.mrf.mxu1 }
 0x456   :  { %1482 = vst [vmem:[#allocation7 + $0xe8] sm:$0xff] %v1450_v24  ;;  %v1352_v14 = vadd.f32 %v1351_v49, %v1262_v25 }
 0x458   :  { %v1386_v27 = vmul.f32 %v1352_v14, %v2565_v50 }
 0x45a   :  { %v1419_v28 = vadd.f32 %v2382_v44, %v1386_v27 }
 0x45c   :  { %v1451_v3 = vmax.f32 %v1419_v28, 0.0 }
 0x45d   :  { %v1353_v32 = vpop.f32.mrf.mxu1 }
 0x45e   :  { %1483 = vst [vmem:[#allocation7 + $0xf0] sm:$0xff] %v1451_v3  ;;  %v1354_v6 = vadd.f32 %v1353_v32, %v1264_v12 }
 0x460   :  { %v1387_v55 = vmul.f32 %v1354_v6, %v2345_v46 }
 0x462   :  { %v1420_v59 = vadd.f32 %v2382_v44, %v1387_v55 }
 0x464   :  { %v1452_v61 = vmax.f32 %v1420_v59, 0.0 }
 0x466   :  { %1484 = vst [vmem:[#allocation7 + $0xf8] sm:$0xff] %v1452_v61 }
 0x467   :  { %1497 = dma.vmem_to_hbm [thread:$0]  %s1490_s25, 4096, %s1492_s3, [#allocation4], %s1771_s26, %s1771_s26, %s1772_s27  }
 0x468   :  { %1768 = dma.done.wait [#allocation4], 4096  }
 0x469   :  { %1769 = vsyncadd [#allocation4], 4294963200 }
 0x46a   :  { %1502 = vsyncpa [#allocation3], 1 }
 0x46b   :  { %1503 = vsyncpa [#allocation6], 1 }
 0x46c   :  { %1504 = vsyncpa [#allocation4], 1 }

</bundles_post_ra>
